<compile_context>
chip_gen: v7x
topology: tpu7x:2x2x1
jax: 0.10.0
libtpu: 0.0.40
codegen_flags: <defaults>
</compile_context>

<pallas_src>
import jax
import jax.numpy as jnp
from jax import lax
from jax.experimental import pallas as pl
from jax.experimental.pallas import tpu as pltpu

# ----------------------------- model hyper-parameters -----------------------
EMB_H, EMB_W = 4, 8
RANK = EMB_H * EMB_W              # 32   (rank == emb_height * emb_width)
COV_CH = 3                        # cov_output_chennel
IN_EMB = COV_CH * RANK            # 96   (input_emb_size)
STRIDE = 8                        # LPPool1d kernel / stride
OUT_EMB = RANK * STRIDE           # 256  (output_emb_size)
N_ENT, N_REL, N_TIME = 256, 16, 32
N_CAR, N_USER = 8, 8
BN_EPS = 1e-5


# ============================= Pallas kernel =================================

def _iem_score_kernel(ent_ref, rel_ref, tmp_ref,
                      we_ref, be_ref, wr_ref, br_ref, wd_ref, bd_ref,
                      pool_ref, rnt_ref, tbl_ref, scores_ref):
    """Fused IEM tail + scoring:
       linear_E/R/d + tanh + product + LPPool1d(p=1) + L2-normalize + *rnt
       + scores = q @ enity_emb_tmp.T  (table passed pre-transposed (RANK, N),
       lane-dense, bf16; all matmuls bf16 x bf16 with f32 accumulation).
    """
    ent = ent_ref[...].astype(jnp.bfloat16)
    rel = rel_ref[...].astype(jnp.bfloat16)
    tmp = tmp_ref[...].astype(jnp.bfloat16)

    e = jnp.tanh(jnp.dot(ent, we_ref[...],
                         preferred_element_type=jnp.float32) + be_ref[...])
    r = jnp.tanh(jnp.dot(rel, wr_ref[...],
                         preferred_element_type=jnp.float32) + br_ref[...])
    d = jnp.tanh(jnp.dot(tmp, wd_ref[...],
                         preferred_element_type=jnp.float32) + bd_ref[...])
    r_ds = e * r * d                                          # (B, OUT_EMB) f32

    # LPPool1d(norm_type=1, kernel=STRIDE, stride=STRIDE) == windowed sum,
    # expressed as a matmul with a 0/1 pooling matrix (MXU friendly).
    pooled = jnp.dot(r_ds.astype(jnp.bfloat16), pool_ref[...],
                     preferred_element_type=jnp.float32)      # (B, RANK)

    # F.normalize(p=2, dim=2): clamp_min(norm, 1e-12)  <=>  clamp sumsq at 1e-24.
    sumsq = jnp.sum(pooled * pooled, axis=-1, keepdims=True)
    q = pooled * lax.rsqrt(jnp.maximum(sumsq, 1e-24))         # EUP rsqrt, f32
    q = q * rnt_ref[...]                                      # torch.mul(x, rnt)

    # scores = q @ enity_emb_tmp.T — table is already (RANK, N_ENT), so this is
    # a plain NN matmul on a lane-dense RHS.
    scores_ref[...] = jnp.dot(q.astype(jnp.bfloat16), tbl_ref[...],
                              preferred_element_type=jnp.float32)


def iem_score(entity, relation, temporal,
              w_e, b_e, w_r, b_r, w_d, b_d, pool_mat, rnt, entity_table_t):
    """entity_table_t: (RANK, N_ENT) bf16 (pre-transposed, lane-dense)."""
    B = entity.shape[0]
    N = entity_table_t.shape[1]
    operands = (entity, relation, temporal, w_e, b_e, w_r, b_r, w_d, b_d,
                pool_mat, rnt, entity_table_t)

    flops = 2 * B * (3 * IN_EMB * OUT_EMB + OUT_EMB * RANK + RANK * N)
    transcendentals = B * (3 * OUT_EMB + 1)                   # tanh x3 + rsqrt
    bytes_accessed = sum(int(o.size) * o.dtype.itemsize for o in operands) \
        + B * N * 4

    # No grid: every operand is tiny and lives whole in VMEM (single TC).
    # TODO(synk): for large B / N_ENT add a "parallel" grid over N_ENT tiles
    #             (q in VMEM scratch) so v7x's second TensorCore is used.
    return pl.pallas_call(
        _iem_score_kernel,
        out_shape=jax.ShapeDtypeStruct((B, N), jnp.float32),
        in_specs=[pl.BlockSpec(memory_space=pltpu.MemorySpace.VMEM)] * len(operands),
        out_specs=pl.BlockSpec(memory_space=pltpu.MemorySpace.VMEM),
        cost_estimate=pl.CostEstimate(flops=flops,
                                      transcendentals=transcendentals,
                                      bytes_accessed=bytes_accessed),
    )(*operands)


# ============================= plain-JAX glue ================================

def conv2d(x, w, b=None, pad=0, groups=1):
    out = lax.conv_general_dilated(
        x, w, window_strides=(1, 1),
        padding=[(pad, pad), (pad, pad)],
        dimension_numbers=('NCHW', 'OIHW', 'NCHW'),
        feature_group_count=groups)
    if b is not None:
        out = out + b.reshape(1, -1, 1, 1)
    return out


def batchnorm_eval(x, gamma, beta):
    # Fresh BatchNorm2d: running_mean=0, running_var=1, applied in eval mode.
    # TODO(synk): the torch forward (train mode) would use per-batch statistics.
    inv = 1.0 / jnp.sqrt(1.0 + BN_EPS)
    return gamma.reshape(1, -1, 1, 1) * (x * inv) + beta.reshape(1, -1, 1, 1)


def grouped_branch(xs, p, groups):
    """N independent Conv3x3+BN+ReLU branches as ONE grouped conv."""
    x = jnp.concatenate(xs, axis=1)                           # (B, G*Cin, H, W)
    h = conv2d(x, p['w'], p['b'], pad=1, groups=groups)
    h = jax.nn.relu(batchnorm_eval(h, p['gamma'], p['beta']))
    cout = h.shape[1] // groups
    return [h[:, i * cout:(i + 1) * cout] for i in range(groups)]


def spatial_attention_batched(xs, w_sa):
    """SpatialAttention (shared sa1 weights) on a list of tensors, batched on
    the batch axis: one conv instead of len(xs)."""
    n = len(xs)
    b = xs[0].shape[0]
    x = jnp.concatenate(xs, axis=0)                           # (n*B, C, H, W)
    avg = jnp.mean(x, axis=1, keepdims=True)
    mx = jnp.max(x, axis=1, keepdims=True)
    cat = jnp.concatenate([avg, mx], axis=1)                  # (n*B, 2, H, W)
    g = jax.nn.relu(jax.nn.sigmoid(conv2d(cat, w_sa, pad=1))) # relu(sigmoid(.))
    return [g[i * b:(i + 1) * b] for i in range(n)]


def enity_emb_apply(params, emb, car=None, user=None):
    # TODO(synk): EnityEmb source unavailable; identity / additive type-embedding stand-in.
    if car is None or user is None:
        return emb
    return emb + params['car_table'][car] + params['user_table'][user]


def temporal_emb_apply(params, t_idx):
    # TODO(synk): TemporalEmb source unavailable; sum of 4 embedding lookups stand-in.
    out = jnp.zeros((t_idx.shape[0], RANK), jnp.float32)
    for i in range(4):
        out = out + params['time_tables'][i][t_idx[:, i]]
    return out


def mrn(params, x):
    lhs = enity_emb_apply(params, x)
    h1 = lhs.reshape(-1, 1, 1, RANK)
    h = conv2d(h1, params['conv21_w'], params['conv21_b'], pad=0)
    h = batchnorm_eval(h, params['bn_MRN_gamma'], params['bn_MRN_beta'])
    h = jax.nn.relu(h)
    h = conv2d(h, params['conv22_w'], params['conv22_b'], pad=0)
    e1 = h.reshape(-1, 1, EMB_H, EMB_W)
    return e1, h1


def qdm(params, e1, r, d):
    e1, r, d = grouped_branch([e1, r, d], params['qdm_branch'], groups=3)
    shared = jnp.zeros_like(e1)
    e1_g, r_g, d_g = spatial_attention_batched(
        [e1 - shared, r - shared, d - shared], params['sa1_w'])
    shared = shared + (e1 - shared) * e1_g + (r - shared) * r_g + (d - shared) * d_g
    e1_dg, r_dg, d_dg = spatial_attention_batched(
        [shared - e1, shared - r, shared - d], params['sa1_w'])
    h = e1 + (shared - e1) * e1_dg
    r = r + (shared - r) * r_dg
    d = d + (shared - d) * d_dg
    h = h.reshape(-1, 1, 1, RANK)
    return h, r, d, shared


def drn(params, h, h1):
    e1 = h1 * jax.nn.sigmoid(h)
    e1 = batchnorm_eval(e1, params['bn_DRN_gamma'], params['bn_DRN_beta'])
    e1 = jax.nn.relu(e1)
    return e1.reshape(-1, 1, EMB_H, EMB_W)


def iem_rounds(params, e1, r, d, shared):
    for k in (1, 2, 3, 4):
        e1, r, d, shared = grouped_branch([e1, r, d, shared],
                                          params[f'iem{k}_branch'], groups=4)
        e1_g, r_g, d_g = spatial_attention_batched(
            [e1 - shared, r - shared, d - shared], params['sa1_w'])
        shared = shared + (e1 - shared) * e1_g + (r - shared) * r_g + (d - shared) * d_g
        e1_dg, r_dg, d_dg = spatial_attention_batched(
            [shared - e1, shared - r, shared - d], params['sa1_w'])
        e1 = e1 + (shared - e1) * e1_dg
        r = r + (shared - r) * r_dg
        d = d + (shared - d) * d_dg
    entity = e1.reshape(-1, IN_EMB)
    relation = r.reshape(-1, IN_EMB)
    temporal = d.reshape(-1, IN_EMB)
    return entity, relation, temporal


def kgen_pred_forward(params, x):
    """x: (B, 9) int32 — [lhs, rel, rhs, t0, t1, t2, t3, car_type, user_type]."""
    users = params['enity_emb_tmp'][x[:, 2]]
    stations = params['enity_emb_tmp'][x[:, 0]]
    rel = params['relation_emb'][x[:, 1]]
    rhs = enity_emb_apply(params, users, x[:, 7], x[:, 8])
    rnt = temporal_emb_apply(params, x[:, 3:7])
    d = rnt.reshape(-1, 1, EMB_H, EMB_W)
    e1, h1 = mrn(params, stations)
    r = rel.reshape(-1, 1, EMB_H, EMB_W)
    h, r, d, shared = qdm(params, e1, r, d)
    h_mr = drn(params, h, h1)
    entity, relation, temporal = iem_rounds(params, h_mr, r, d, shared)
    # --- single fused Pallas kernel: IEM tail + pool + normalize + *rnt + scores ---
    scores = iem_score(entity, relation, temporal,
                       params['linE_w'], params['linE_b'],
                       params['linR_w'], params['linR_b'],
                       params['linD_w'], params['linD_b'],
                       params['pool_mat'], rnt, params['enity_emb_tmp_t'])
    regularizer = (entity, relation, temporal, rhs)
    return scores, regularizer, None


# ============================= parameter init ================================

def init_params(key):
    keys = jax.random.split(key, 64)
    it = iter(keys)
    nrm = lambda shape, s=0.05: s * jax.random.normal(next(it), shape, jnp.float32)

    p = {}
    p['enity_emb_tmp'] = jax.random.normal(next(it), (N_ENT, RANK), jnp.float32)
    # One-time transposed, lane-dense, bf16 copy for the score matmul.
    p['enity_emb_tmp_t'] = p['enity_emb_tmp'].T.astype(jnp.bfloat16)
    p['relation_emb'] = nrm((N_REL, RANK), 0.01)
    p['time_tables'] = [nrm((N_TIME, RANK), 0.01) for _ in range(4)]
    p['car_table'] = nrm((N_CAR, RANK), 0.01)
    p['user_table'] = nrm((N_USER, RANK), 0.01)
    p['sa1_w'] = nrm((1, 2, 3, 3))                     # SpatialAttention conv (no bias)
    p['conv21_w'] = nrm((2, 1, 1, 1)); p['conv21_b'] = nrm((2,))
    p['conv22_w'] = nrm((1, 2, 1, 1)); p['conv22_b'] = nrm((1,))
    p['bn_MRN_gamma'] = jnp.ones((2,), jnp.float32)
    p['bn_MRN_beta'] = jnp.zeros((2,), jnp.float32)
    p['bn_DRN_gamma'] = jnp.ones((1,), jnp.float32)
    p['bn_DRN_beta'] = jnp.zeros((1,), jnp.float32)

    def mk_grouped(n_streams, cin, cout):
        # N independent Conv3x3(+bias)+BN branches stored as one grouped conv.
        return {'w': nrm((n_streams * cout, cin, 3, 3)),
                'b': nrm((n_streams * cout,)),
                'gamma': jnp.ones((n_streams * cout,), jnp.float32),
                'beta': jnp.zeros((n_streams * cout,), jnp.float32)}

    p['qdm_branch'] = mk_grouped(3, 1, 1)              # branch_e1 / _r / _d
    p['iem1_branch'] = mk_grouped(4, 1, COV_CH)        # branch1_{e1,r,d,s}
    for k in (2, 3, 4):
        p[f'iem{k}_branch'] = mk_grouped(4, COV_CH, COV_CH)

    # torch Linear is y = x @ W.T + b ; store W transposed as (in, out), bf16.
    p['linE_w'] = nrm((IN_EMB, OUT_EMB)).astype(jnp.bfloat16)
    p['linE_b'] = nrm((1, OUT_EMB))
    p['linR_w'] = nrm((IN_EMB, OUT_EMB)).astype(jnp.bfloat16)
    p['linR_b'] = nrm((1, OUT_EMB))
    p['linD_w'] = nrm((IN_EMB, OUT_EMB)).astype(jnp.bfloat16)
    p['linD_b'] = nrm((1, OUT_EMB))

    # 0/1 matrix implementing LPPool1d(norm_type=1, kernel=STRIDE, stride=STRIDE);
    # exact in bf16.  TODO(synk): at real dims replace with a windowed lane sum.
    p['pool_mat'] = (jnp.arange(OUT_EMB)[:, None] // STRIDE
                     == jnp.arange(RANK)[None, :]).astype(jnp.bfloat16)
    return p


# ================================== main =====================================

if __name__ == "__main__":
    key = jax.random.PRNGKey(0)
    k_params, k1, k2, k3, k4, k5, k6 = jax.random.split(key, 7)
    params = init_params(k_params)

    B = 128  # fill MXU rows (weight-push dominated matmuls; throughput ~ B)
    x = jnp.concatenate([
        jax.random.randint(k1, (B, 1), 0, N_ENT),     # lhs entity
        jax.random.randint(k2, (B, 1), 0, N_REL),     # relation
        jax.random.randint(k3, (B, 1), 0, N_ENT),     # rhs entity
        jax.random.randint(k4, (B, 4), 0, N_TIME),    # 4 temporal features
        jax.random.randint(k5, (B, 1), 0, N_CAR),     # car type
        jax.random.randint(k6, (B, 1), 0, N_USER),    # user type
    ], axis=1).astype(jnp.int32)

    fwd = jax.jit(kgen_pred_forward)
    scores, regularizer, _ = fwd(params, x)
    scores = jax.block_until_ready(scores)

    assert scores.shape == (B, N_ENT)
    assert regularizer[0].shape == (B, IN_EMB)
    assert not bool(jnp.any(jnp.isnan(scores)))
    print("KERNEL_OK")
</pallas_src>

<mosaic_0001>
module attributes {stable_mosaic.version = 11 : i64} {
  func.func @_iem_score_kernel(%arg0: memref<128x96xf32, #tpu.memory_space<vmem>>, %arg1: memref<128x96xf32, #tpu.memory_space<vmem>>, %arg2: memref<128x96xf32, #tpu.memory_space<vmem>>, %arg3: memref<96x256xbf16, #tpu.memory_space<vmem>>, %arg4: memref<1x256xf32, #tpu.memory_space<vmem>>, %arg5: memref<96x256xbf16, #tpu.memory_space<vmem>>, %arg6: memref<1x256xf32, #tpu.memory_space<vmem>>, %arg7: memref<96x256xbf16, #tpu.memory_space<vmem>>, %arg8: memref<1x256xf32, #tpu.memory_space<vmem>>, %arg9: memref<256x32xbf16, #tpu.memory_space<vmem>>, %arg10: memref<128x32xf32, #tpu.memory_space<vmem>>, %arg11: memref<32x256xbf16, #tpu.memory_space<vmem>>, %arg12: memref<128x256xf32, #tpu.memory_space<vmem>>) attributes {dimension_semantics = [], scalar_prefetch = 0 : i64, scratch_operands = 0 : i64, tpu.core_type = #tpu.core_type<tc>} {
    %c0 = arith.constant 0 : index
    %c0_0 = arith.constant 0 : index
    %0 = vector.load %arg0[%c0, %c0_0] : memref<128x96xf32, #tpu.memory_space<vmem>>, vector<128x96xf32>
    %1 = arith.truncf %0 : vector<128x96xf32> to vector<128x96xbf16>
    %c0_1 = arith.constant 0 : index
    %c0_2 = arith.constant 0 : index
    %2 = vector.load %arg1[%c0_1, %c0_2] : memref<128x96xf32, #tpu.memory_space<vmem>>, vector<128x96xf32>
    %3 = arith.truncf %2 : vector<128x96xf32> to vector<128x96xbf16>
    %c0_3 = arith.constant 0 : index
    %c0_4 = arith.constant 0 : index
    %4 = vector.load %arg2[%c0_3, %c0_4] : memref<128x96xf32, #tpu.memory_space<vmem>>, vector<128x96xf32>
    %5 = arith.truncf %4 : vector<128x96xf32> to vector<128x96xbf16>
    %c0_5 = arith.constant 0 : index
    %c0_6 = arith.constant 0 : index
    %6 = vector.load %arg3[%c0_5, %c0_6] : memref<96x256xbf16, #tpu.memory_space<vmem>>, vector<96x256xbf16>
    %cst = arith.constant dense<0.000000e+00> : vector<128x256xf32>
    %7 = tpu.matmul %1, %6, %cst {dimension_numbers = #tpu.dot_dimension_numbers<[1], [0], [0], [1], [0, 0, 1, 1], [], []>} : vector<128x96xbf16>, vector<96x256xbf16>, vector<128x256xf32> -> vector<128x256xf32>
    %c0_7 = arith.constant 0 : index
    %c0_8 = arith.constant 0 : index
    %8 = vector.load %arg4[%c0_7, %c0_8] : memref<1x256xf32, #tpu.memory_space<vmem>>, vector<1x256xf32>
    %9 = vector.broadcast %8 : vector<1x256xf32> to vector<128x256xf32>
    %10 = arith.addf %7, %9 : vector<128x256xf32>
    %11 = math.tanh %10 : vector<128x256xf32>
    %c0_9 = arith.constant 0 : index
    %c0_10 = arith.constant 0 : index
    %12 = vector.load %arg5[%c0_9, %c0_10] : memref<96x256xbf16, #tpu.memory_space<vmem>>, vector<96x256xbf16>
    %cst_11 = arith.constant dense<0.000000e+00> : vector<128x256xf32>
    %13 = tpu.matmul %3, %12, %cst_11 {dimension_numbers = #tpu.dot_dimension_numbers<[1], [0], [0], [1], [0, 0, 1, 1], [], []>} : vector<128x96xbf16>, vector<96x256xbf16>, vector<128x256xf32> -> vector<128x256xf32>
    %c0_12 = arith.constant 0 : index
    %c0_13 = arith.constant 0 : index
    %14 = vector.load %arg6[%c0_12, %c0_13] : memref<1x256xf32, #tpu.memory_space<vmem>>, vector<1x256xf32>
    %15 = vector.broadcast %14 : vector<1x256xf32> to vector<128x256xf32>
    %16 = arith.addf %13, %15 : vector<128x256xf32>
    %17 = math.tanh %16 : vector<128x256xf32>
    %c0_14 = arith.constant 0 : index
    %c0_15 = arith.constant 0 : index
    %18 = vector.load %arg7[%c0_14, %c0_15] : memref<96x256xbf16, #tpu.memory_space<vmem>>, vector<96x256xbf16>
    %cst_16 = arith.constant dense<0.000000e+00> : vector<128x256xf32>
    %19 = tpu.matmul %5, %18, %cst_16 {dimension_numbers = #tpu.dot_dimension_numbers<[1], [0], [0], [1], [0, 0, 1, 1], [], []>} : vector<128x96xbf16>, vector<96x256xbf16>, vector<128x256xf32> -> vector<128x256xf32>
    %c0_17 = arith.constant 0 : index
    %c0_18 = arith.constant 0 : index
    %20 = vector.load %arg8[%c0_17, %c0_18] : memref<1x256xf32, #tpu.memory_space<vmem>>, vector<1x256xf32>
    %21 = vector.broadcast %20 : vector<1x256xf32> to vector<128x256xf32>
    %22 = arith.addf %19, %21 : vector<128x256xf32>
    %23 = math.tanh %22 : vector<128x256xf32>
    %24 = arith.mulf %11, %17 : vector<128x256xf32>
    %25 = arith.mulf %24, %23 : vector<128x256xf32>
    %26 = arith.truncf %25 : vector<128x256xf32> to vector<128x256xbf16>
    %c0_19 = arith.constant 0 : index
    %c0_20 = arith.constant 0 : index
    %27 = vector.load %arg9[%c0_19, %c0_20] : memref<256x32xbf16, #tpu.memory_space<vmem>>, vector<256x32xbf16>
    %cst_21 = arith.constant dense<0.000000e+00> : vector<128x32xf32>
    %28 = tpu.matmul %26, %27, %cst_21 {dimension_numbers = #tpu.dot_dimension_numbers<[1], [0], [0], [1], [0, 0, 1, 1], [], []>} : vector<128x256xbf16>, vector<256x32xbf16>, vector<128x32xf32> -> vector<128x32xf32>
    %29 = arith.mulf %28, %28 : vector<128x32xf32>
    %cst_22 = arith.constant dense<0.000000e+00> : vector<128xf32>
    %30 = vector.multi_reduction <add>, %29, %cst_22 [1] : vector<128x32xf32> to vector<128xf32>
    %31 = vector.shape_cast %30 : vector<128xf32> to vector<128x1xf32>
    %cst_23 = arith.constant 1.000000e-24 : f32
    %32 = vector.broadcast %cst_23 : f32 to vector<128x1xf32>
    %33 = arith.maximumf %31, %32 : vector<128x1xf32>
    %34 = math.rsqrt %33 : vector<128x1xf32>
    %35 = vector.broadcast %34 : vector<128x1xf32> to vector<128x32xf32>
    %36 = arith.mulf %28, %35 : vector<128x32xf32>
    %c0_24 = arith.constant 0 : index
    %c0_25 = arith.constant 0 : index
    %37 = vector.load %arg10[%c0_24, %c0_25] : memref<128x32xf32, #tpu.memory_space<vmem>>, vector<128x32xf32>
    %38 = arith.mulf %36, %37 : vector<128x32xf32>
    %39 = arith.truncf %38 : vector<128x32xf32> to vector<128x32xbf16>
    %c0_26 = arith.constant 0 : index
    %c0_27 = arith.constant 0 : index
    %40 = vector.load %arg11[%c0_26, %c0_27] : memref<32x256xbf16, #tpu.memory_space<vmem>>, vector<32x256xbf16>
    %cst_28 = arith.constant dense<0.000000e+00> : vector<128x256xf32>
    %41 = tpu.matmul %39, %40, %cst_28 {dimension_numbers = #tpu.dot_dimension_numbers<[1], [0], [0], [1], [0, 0, 1, 1], [], []>} : vector<128x32xbf16>, vector<32x256xbf16>, vector<128x256xf32> -> vector<128x256xf32>
    %c0_29 = arith.constant 0 : index
    %c0_30 = arith.constant 0 : index
    %42 = vector.load %arg12[%c0_29, %c0_30] : memref<128x256xf32, #tpu.memory_space<vmem>>, vector<128x256xf32>
    tpu.vector_store %arg12[%c0_29, %c0_30], %41 {strides = array<i32>} : memref<128x256xf32, #tpu.memory_space<vmem>>, vector<128x256xf32>,
    return
  }
}

</mosaic_0001>

<bundles_post_ra>
// kernel: kgen_pred_forward.1
= control target key start
LH: loop header
LB: loop body
LE: loop exit
PB: predicated region body
PF: predicated region fallthrough
CT: control target
= control target key end

     0   :  { %v2034_v2 = vmov 0   ;;  %vm199_vm0 = vcmask 785408   ;;  %s2864_s0 = inlined_call_operand.vmem [shape: f32[128,96], index: 0, kind: input, shape index: {}]   ;;  %s2865_s1 = inlined_call_operand.vmem [shape: f32[128,96], index: 1, kind: input, shape index: {}]   ;;  %s2866_s2 = inlined_call_operand.vmem [shape: f32[128,96], index: 2, kind: input, shape index: {}]   ;;  %s2867_s3 = inlined_call_operand.vmem [shape: bf16[96,256], index: 3, kind: input, shape index: {}]   ;;  %s2868_s4 = inlined_call_operand.vmem [shape: f32[1,256], index: 4, kind: input, shape index: {}]   ;;  %s2869_s5 = inlined_call_operand.vmem [shape: bf16[96,256], index: 5, kind: input, shape index: {}]   ;;  %s2870_s6 = inlined_call_operand.vmem [shape: f32[1,256], index: 6, kind: input, shape index: {}]   ;;  %s2871_s7 = inlined_call_operand.vmem [shape: bf16[96,256], index: 7, kind: input, shape index: {}]   ;;  %s2872_s8 = inlined_call_operand.vmem [shape: f32[1,256], index: 8, kind: input, shape index: {}]   ;;  %s2873_s9 = inlined_call_operand.vmem [shape: bf16[256,32], index: 9, kind: input, shape index: {}]   ;;  %s2874_s10 = inlined_call_operand.vmem [shape: f32[128,32], index: 10, kind: input, shape index: {}]   ;;  %s2875_s11 = inlined_call_operand.vmem [shape: bf16[32,256], index: 11, kind: input, shape index: {}]   ;;  %s2876_s12 = inlined_call_operand.hbm [shape: f32[128,256], index: 12, kind: output, shape index: {}]  }
   0x1   :  { %v1710_v0 = vld [vmem:[%s2867_s3 + $0x4] ss:$8 sps:$4 sm:$0xff]   ;;  %v1712_v1 = vld [vmem:[%s2867_s3] ss:$8 sps:$4 sm:$0xff]   ;;  %256 = vmatprep.mubr.bf16.mxu0 %v2034_v2  ;;  %296 = vmatprep.mubr.bf16.mxu1 %v2034_v2  ;;  %v1713_v3 = vld [vmem:[%s2867_s3 + $0x14] ss:$8 sps:$4 sm:$0xff]  }
   0x2   :  { %224 = vmatprep.subr.bf16.mxu0 %v1710_v0  ;;  %1694 = vmatprep.subr.bf16.mxu1 %v1710_v0  ;;  %v1715_v4 = vld [vmem:[%s2867_s3 + $0x10] ss:$8 sps:$4 sm:$0xff]   ;;  %v1716_v5 = vld [vmem:[%s2867_s3 + $0x24] ss:$8 sps:$4 sm:$0xff]   ;;  %v1718_v6 = vld [vmem:[%s2867_s3 + $0x20] ss:$8 sps:$4 sm:$0xff]  }
   0x3   :  { %225 = vmatpush1.bf16.msra.mxu0 %v1712_v1  ;;  %1700 = vmatpush1.bf16.msra.mxu1 %v1712_v1  ;;  %v1719_v7 = vld [vmem:[%s2867_s3 + $0x34] ss:$8 sps:$4 sm:$0xff]   ;;  %v1721_v8 = vld [vmem:[%s2867_s3 + $0x30] ss:$8 sps:$4 sm:$0xff]   ;;  %v1722_v9 = vld [vmem:[%s2867_s3 + $0x44] ss:$8 sps:$4 sm:$0xff]  }
   0x4   :  { %226 = vmatprep.subr.bf16.mxu0 %v1713_v3  ;;  %1695 = vmatprep.subr.bf16.mxu1 %v1713_v3  ;;  %v1724_v10 = vld [vmem:[%s2867_s3 + $0x40] ss:$8 sps:$4 sm:$0xff]   ;;  %v1725_v11 = vld [vmem:[%s2867_s3 + $0x54] ss:$8 sps:$4 sm:$0xff]   ;;  %v1727_v12 = vld [vmem:[%s2867_s3 + $0x50] ss:$8 sps:$4 sm:$0xff]  }
   0x5   :  { %v43_v13 = vld [vmem:[%s2864_s0] sm:$0xff]  ;;  %v44_v14 = vld [vmem:[%s2864_s0 + $0x8] sm:$0xff]  ;;  %v1736_v23 = vld [vmem:[%s2869_s5 + $0x14] ss:$8 sps:$4 sm:$0xff]  }
   0x6   :  { %v51_v15 = vld [vmem:[%s2864_s0 + $0x40] sm:$0xff]  ;;  %v52_v16 = vld [vmem:[%s2864_s0 + $0x48] sm:$0xff]  ;;  %v59_v19 = vpack.c.bf16 %v44_v14, %v43_v13  ;;  %v1734_v24 = vld [vmem:[%s2869_s5 + $0x10] ss:$8 sps:$4 sm:$0xff]  }
   0x7   :  { %227 = vmatpush1.bf16.msra.mxu0 %v1715_v4  ;;  %1701 = vmatpush1.bf16.msra.mxu1 %v1715_v4  ;;  %v1730_v17 = vld [vmem:[%s2869_s5 + $0x4] ss:$8 sps:$4 sm:$0xff]   ;;  %v63_v20 = vpack.c.bf16 %v52_v16, %v51_v15  ;;  %v1728_v21 = vld [vmem:[%s2869_s5] ss:$8 sps:$4 sm:$0xff]   ;;  %v45_v25 = vld [vmem:[%s2864_s0 + $0x10] sm:$0xff] }
   0x8   :  { %228 = vmatprep.subr.bf16.mxu0 %v1716_v5  ;;  %1696 = vmatprep.subr.bf16.mxu1 %v1716_v5  ;;  %v1733_v18 = vld [vmem:[%s2871_s7 + $0x4] ss:$8 sps:$4 sm:$0xff]   ;;  %v1731_v22 = vld [vmem:[%s2871_s7] ss:$8 sps:$4 sm:$0xff]   ;;  %v46_v26 = vld [vmem:[%s2864_s0 + $0x18] sm:$0xff] }
   0x9   :  { %v1739_v27 = vld [vmem:[%s2871_s7 + $0x14] ss:$8 sps:$4 sm:$0xff]   ;;  %v1737_v30 = vld [vmem:[%s2871_s7 + $0x10] ss:$8 sps:$4 sm:$0xff]   ;;  %v1742_v31 = vld [vmem:[%s2869_s5 + $0x24] ss:$8 sps:$4 sm:$0xff]   ;;  %v60_v33 = vpack.c.bf16 %v46_v26, %v45_v25 }
   0xa   :  { %v53_v28 = vld [vmem:[%s2864_s0 + $0x50] sm:$0xff]  ;;  %v54_v29 = vld [vmem:[%s2864_s0 + $0x58] sm:$0xff]  ;;  %v1745_v32 = vld [vmem:[%s2871_s7 + $0x24] ss:$8 sps:$4 sm:$0xff]  }
   0xb   :  { %229 = vmatpush1.bf16.msra.mxu0 %v1718_v6  ;;  %1702 = vmatpush1.bf16.msra.mxu1 %v1718_v6  ;;  %v64_v34 = vpack.c.bf16 %v54_v29, %v53_v28  ;;  %v1740_v35 = vld [vmem:[%s2869_s5 + $0x20] ss:$8 sps:$4 sm:$0xff]   ;;  %v1748_v37 = vld [vmem:[%s2869_s5 + $0x34] ss:$8 sps:$4 sm:$0xff]   ;;  %v1746_v43 = vld [vmem:[%s2869_s5 + $0x30] ss:$8 sps:$4 sm:$0xff]  }
   0xc   :  { %230 = vmatprep.subr.bf16.mxu0 %v1719_v7  ;;  %1697 = vmatprep.subr.bf16.mxu1 %v1719_v7  ;;  %v1743_v36 = vld [vmem:[%s2871_s7 + $0x20] ss:$8 sps:$4 sm:$0xff]   ;;  %v1751_v38 = vld [vmem:[%s2871_s7 + $0x34] ss:$8 sps:$4 sm:$0xff]   ;;  %v1749_v44 = vld [vmem:[%s2871_s7 + $0x30] ss:$8 sps:$4 sm:$0xff]  }
   0xd   :  { %v47_v39 = vld [vmem:[%s2864_s0 + $0x20] sm:$0xff]  ;;  %v48_v40 = vld [vmem:[%s2864_s0 + $0x28] sm:$0xff]  ;;  %v1760_v51 = vld [vmem:[%s2869_s5 + $0x54] ss:$8 sps:$4 sm:$0xff]  }
   0xe   :  { %v55_v41 = vld [vmem:[%s2864_s0 + $0x60] sm:$0xff]  ;;  %v56_v42 = vld [vmem:[%s2864_s0 + $0x68] sm:$0xff]  ;;  %v61_v47 = vpack.c.bf16 %v48_v40, %v47_v39  ;;  %v49_v52 = vld [vmem:[%s2864_s0 + $0x30] sm:$0xff] }
   0xf   :  { %231 = vmatpush1.bf16.msra.mxu0 %v1721_v8  ;;  %1703 = vmatpush1.bf16.msra.mxu1 %v1721_v8  ;;  %v1754_v45 = vld [vmem:[%s2869_s5 + $0x44] ss:$8 sps:$4 sm:$0xff]   ;;  %v65_v48 = vpack.c.bf16 %v56_v42, %v55_v41  ;;  %v1752_v49 = vld [vmem:[%s2869_s5 + $0x40] ss:$8 sps:$4 sm:$0xff]   ;;  %v50_v53 = vld [vmem:[%s2864_s0 + $0x38] sm:$0xff] }
  0x10   :  { %232 = vmatprep.subr.bf16.mxu0 %v1722_v9  ;;  %1698 = vmatprep.subr.bf16.mxu1 %v1722_v9  ;;  %v1757_v46 = vld [vmem:[%s2871_s7 + $0x44] ss:$8 sps:$4 sm:$0xff]   ;;  %v1755_v50 = vld [vmem:[%s2871_s7 + $0x40] ss:$8 sps:$4 sm:$0xff]   ;;  %v57_v54 = vld [vmem:[%s2864_s0 + $0x70] sm:$0xff]  ;;  %v62_v60 = vpack.c.bf16 %v50_v53, %v49_v52 }
  0x11   :  { %v58_v55 = vld [vmem:[%s2864_s0 + $0x78] sm:$0xff]  ;;  %v1764_v59 = vld [vmem:[%s2873_s9 + $0x40] sm:$0xff]   ;;  %v68_v63 = vld [vmem:[%s2865_s1 + $0x8] sm:$0xff] }
  0x12   :  { %v1763_v56 = vld [vmem:[%s2871_s7 + $0x54] ss:$8 sps:$4 sm:$0xff]   ;;  %v1758_v57 = vld [vmem:[%s2869_s5 + $0x50] ss:$8 sps:$4 sm:$0xff]   ;;  %v66_v61 = vpack.c.bf16 %v58_v55, %v57_v54  ;;  %v67_v62 = vld [vmem:[%s2865_s1] sm:$0xff] }
  0x13   :  { %233 = vmatpush1.bf16.msra.mxu0 %v1724_v10  ;;  %1704 = vmatpush1.bf16.msra.mxu1 %v1724_v10  ;;  %v1761_v58 = vld [vmem:[%s2871_s7 + $0x50] ss:$8 sps:$4 sm:$0xff]   ;;  %v91_v0 = vld [vmem:[%s2866_s2] sm:$0xff]  ;;  %v92_v1 = vld [vmem:[%s2866_s2 + $0x8] sm:$0xff] }
  0x14   :  { %234 = vmatprep.subr.bf16.mxu0 %v1725_v11  ;;  %1699 = vmatprep.subr.bf16.mxu1 %v1725_v11 }
  0x17   :  { %235 = vmatpush1.bf16.msra.mxu0 %v1727_v12  ;;  %1705 = vmatpush1.bf16.msra.mxu1 %v1727_v12 }
  0x18   :  { %477 = vmatprep.subr.bf16.mxu1 %v1730_v17  ;;  %730 = vmatprep.subr.bf16.mxu0 %v1733_v18 }
  0x1a   :  { %1554 = vmatmul.mubr.msk.bf16.vlgmr.msra.gmra.mrb[0].mxu0 %vm199_vm0, %v59_v19  ;;  %1558 = vmatmul.mubr.msk.bf16.vlgmr.msra.gmra.mrb[0].mxu1 %vm199_vm0, %v63_v20 }
  0x1b   :  { %478 = vmatpush1.bf16.msra.mxu1 %v1728_v21  ;;  %731 = vmatpush1.bf16.msra.mxu0 %v1731_v22 }
  0x1c   :  { %479 = vmatprep.subr.bf16.mxu1 %v1736_v23  ;;  %266 = vmatprep.mubr.bf16.mxu0 %v2034_v2 }
  0x1d   :  { %306 = vmatprep.mubr.bf16.mxu1 %v2034_v2  ;;  %732 = vmatprep.subr.bf16.mxu0 %v1739_v27 }
  0x1f   :  { %480 = vmatpush1.bf16.msra.mxu1 %v1734_v24  ;;  %733 = vmatpush1.bf16.msra.mxu0 %v1737_v30 }
  0x20   :  { %481 = vmatprep.subr.bf16.mxu1 %v1742_v31  ;;  %734 = vmatprep.subr.bf16.mxu0 %v1745_v32 }
  0x22   :  { %1555 = vmatmul.mubr.msk.bf16.gmra.mrb[4].mxu0 %vm199_vm0, %v60_v33  ;;  %1559 = vmatmul.mubr.msk.bf16.gmra.mrb[4].mxu1 %vm199_vm0, %v64_v34 }
  0x23   :  { %482 = vmatpush1.bf16.msra.mxu1 %v1740_v35  ;;  %735 = vmatpush1.bf16.msra.mxu0 %v1743_v36 }
  0x24   :  { %276 = vmatprep.mubr.bf16.mxu0 %v2034_v2  ;;  %316 = vmatprep.mubr.bf16.mxu1 %v2034_v2 }
  0x25   :  { %483 = vmatprep.subr.bf16.mxu1 %v1748_v37  ;;  %736 = vmatprep.subr.bf16.mxu0 %v1751_v38 }
  0x27   :  { %484 = vmatpush1.bf16.msra.mxu1 %v1746_v43  ;;  %737 = vmatpush1.bf16.msra.mxu0 %v1749_v44 }
  0x28   :  { %485 = vmatprep.subr.bf16.mxu1 %v1754_v45  ;;  %738 = vmatprep.subr.bf16.mxu0 %v1757_v46 }
  0x2a   :  { %1556 = vmatmul.mubr.msk.bf16.gmra.mrb[8].mxu0 %vm199_vm0, %v61_v47  ;;  %1560 = vmatmul.mubr.msk.bf16.gmra.mrb[8].mxu1 %vm199_vm0, %v65_v48 }
  0x2b   :  { %286 = vmatprep.mubr.bf16.mxu0 %v2034_v2  ;;  %326 = vmatprep.mubr.bf16.mxu1 %v2034_v2 }
  0x2c   :  { %486 = vmatpush1.bf16.msra.mxu1 %v1752_v49  ;;  %739 = vmatpush1.bf16.msra.mxu0 %v1755_v50 }
  0x2d   :  { %487 = vmatprep.subr.bf16.mxu1 %v1760_v51  ;;  %740 = vmatprep.subr.bf16.mxu0 %v1763_v56 }
  0x30   :  { %488 = vmatpush1.bf16.msra.mxu1 %v1758_v57  ;;  %741 = vmatpush1.bf16.msra.mxu0 %v1761_v58 }
  0x31   :  { %1630 = vmatprep.subr.bf16.mxu1 %v1764_v59 }
  0x32   :  { %1557 = vmatmul.mubr.msk.bf16.gmra.mrb[12].mxu0 %vm199_vm0, %v62_v60  ;;  %1561 = vmatmul.mubr.msk.bf16.gmra.mrb[12].mxu1 %vm199_vm0, %v66_v61 }
  0x33   :  { %509 = vmatprep.mubr.bf16.mxu1 %v2034_v2  ;;  %762 = vmatprep.mubr.bf16.mxu0 %v2034_v2 }
  0x34   :  { %17 = vsyncpa [#allocation3], 0  ;;  %v83_v3 = vpack.c.bf16 %v68_v63, %v67_v62  ;;  %v107_v4 = vpack.c.bf16 %v92_v1, %v91_v0  ;;  %v1765_v5 = vld [vmem:[%s2873_s9] sm:$0xff]   ;;  %v69_v6 = vld [vmem:[%s2865_s1 + $0x10] sm:$0xff]  ;;  %v129_v62 = vlaneseq  ;;  %vm1196_vm1 = vcmask 261120  }
  0x35   :  { %v70_v7 = vld [vmem:[%s2865_s1 + $0x18] sm:$0xff]  ;;  %v93_v8 = vld [vmem:[%s2866_s2 + $0x10] sm:$0xff]  ;;  %v71_v12 = vld [vmem:[%s2865_s1 + $0x20] sm:$0xff] }
  0x36   :  { %v94_v9 = vld [vmem:[%s2866_s2 + $0x18] sm:$0xff]  ;;  %v84_v10 = vpack.c.bf16 %v70_v7, %v69_v6  ;;  %v72_v13 = vld [vmem:[%s2865_s1 + $0x28] sm:$0xff]  ;;  %v95_v14 = vld [vmem:[%s2866_s2 + $0x20] sm:$0xff]  ;;  %v130_v63 = vshrl.u32 %v129_v62, 7 }
  0x37   :  { %v108_v11 = vpack.c.bf16 %v94_v9, %v93_v8  ;;  %v96_v15 = vld [vmem:[%s2866_s2 + $0x28] sm:$0xff]  ;;  %v85_v16 = vpack.c.bf16 %v72_v13, %v71_v12  ;;  %v73_v18 = vld [vmem:[%s2865_s1 + $0x30] sm:$0xff]  ;;  %v74_v19 = vld [vmem:[%s2865_s1 + $0x38] sm:$0xff] }
  0x38   :  { %v109_v17 = vpack.c.bf16 %v96_v15, %v95_v14  ;;  %v97_v20 = vld [vmem:[%s2866_s2 + $0x30] sm:$0xff]  ;;  %v98_v21 = vld [vmem:[%s2866_s2 + $0x38] sm:$0xff]  ;;  %v86_v22 = vpack.c.bf16 %v74_v19, %v73_v18  ;;  %v75_v24 = vld [vmem:[%s2865_s1 + $0x40] sm:$0xff]  ;;  %v2452_v0 = vsub.s32 0, %v130_v63 }
  0x39   :  { %v110_v23 = vpack.c.bf16 %v98_v21, %v97_v20  ;;  %v76_v25 = vld [vmem:[%s2865_s1 + $0x48] sm:$0xff]  ;;  %v99_v26 = vld [vmem:[%s2866_s2 + $0x40] sm:$0xff]  ;;  %v77_v30 = vld [vmem:[%s2865_s1 + $0x50] sm:$0xff] }
  0x3a   :  { %1574 = vmatmul.mubr.msk.bf16.vlgmr.msra.gmra.mrb[16].mxu1 %vm199_vm0, %v83_v3  ;;  %1594 = vmatmul.mubr.msk.bf16.vlgmr.msra.gmra.mrb[16].mxu0 %vm199_vm0, %v107_v4  ;;  %v100_v27 = vld [vmem:[%s2866_s2 + $0x48] sm:$0xff]  ;;  %v87_v28 = vpack.c.bf16 %v76_v25, %v75_v24  ;;  %v78_v31 = vld [vmem:[%s2865_s1 + $0x58] sm:$0xff]  ;;  %v101_v32 = vld [vmem:[%s2866_s2 + $0x50] sm:$0xff]  ;;  %v2457_v3 = vsub.s32 1, %v130_v63 }
  0x3b   :  { %519 = vmatprep.mubr.bf16.mxu1 %v2034_v2  ;;  %772 = vmatprep.mubr.bf16.mxu0 %v2034_v2  ;;  %v111_v29 = vpack.c.bf16 %v100_v27, %v99_v26  ;;  %v102_v33 = vld [vmem:[%s2866_s2 + $0x58] sm:$0xff]  ;;  %v88_v34 = vpack.c.bf16 %v78_v31, %v77_v30  ;;  %v79_v36 = vld [vmem:[%s2865_s1 + $0x60] sm:$0xff]  ;;  %v80_v37 = vld [vmem:[%s2865_s1 + $0x68] sm:$0xff] }
  0x3c   :  { %1631 = vmatpush3.bf16.msra.mxu1 %v1765_v5  ;;  %v112_v35 = vpack.c.bf16 %v102_v33, %v101_v32  ;;  %v103_v38 = vld [vmem:[%s2866_s2 + $0x60] sm:$0xff]  ;;  %v104_v39 = vld [vmem:[%s2866_s2 + $0x68] sm:$0xff]  ;;  %v89_v40 = vpack.c.bf16 %v80_v37, %v79_v36  ;;  %v81_v42 = vld [vmem:[%s2865_s1 + $0x70] sm:$0xff] }
  0x3d   :  { %v113_v41 = vpack.c.bf16 %v104_v39, %v103_v38  ;;  %v82_v43 = vld [vmem:[%s2865_s1 + $0x78] sm:$0xff]  ;;  %v105_v44 = vld [vmem:[%s2866_s2 + $0x70] sm:$0xff]  ;;  %v1766_v48 = vld [vmem:[%s2873_s9 + $0x48] sm:$0xff]  }
  0x3e   :  { %v106_v45 = vld [vmem:[%s2866_s2 + $0x78] sm:$0xff]  ;;  %v90_v46 = vpack.c.bf16 %v82_v43, %v81_v42  ;;  %1632 = vmatprep.subr.bf16.mxu1 %v1766_v48  ;;  %v1767_v49 = vld [vmem:[%s2873_s9 + $0x8] sm:$0xff]   ;;  %v1768_v50 = vld [vmem:[%s2873_s9 + $0x50] sm:$0xff]  }
  0x3f   :  { %v114_v47 = vpack.c.bf16 %v106_v45, %v105_v44  ;;  %v1769_v51 = vld [vmem:[%s2873_s9 + $0x10] sm:$0xff]   ;;  %v1770_v52 = vld [vmem:[%s2873_s9 + $0x58] sm:$0xff]   ;;  %v1772_v54 = vld [vmem:[%s2873_s9 + $0x60] sm:$0xff]  }
  0x40   :  { %1633 = vmatpush3.bf16.msra.mxu1 %v1767_v49  ;;  %v1771_v53 = vld [vmem:[%s2873_s9 + $0x18] sm:$0xff]   ;;  %v1773_v55 = vld [vmem:[%s2873_s9 + $0x20] sm:$0xff]   ;;  %v1774_v56 = vld [vmem:[%s2873_s9 + $0x68] sm:$0xff]  }
  0x41   :  { %1634 = vmatprep.subr.bf16.mxu1 %v1768_v50  ;;  %v1775_v57 = vld [vmem:[%s2873_s9 + $0x28] sm:$0xff]   ;;  %v1776_v58 = vld [vmem:[%s2873_s9 + $0x70] sm:$0xff]   ;;  %v1778_v60 = vld [vmem:[%s2873_s9 + $0x78] sm:$0xff]  }
  0x42   :  { %1575 = vmatmul.mubr.msk.bf16.gmra.mrb[20].mxu1 %vm199_vm0, %v84_v10  ;;  %1595 = vmatmul.mubr.msk.bf16.gmra.mrb[20].mxu0 %vm199_vm0, %v108_v11  ;;  %v1777_v59 = vld [vmem:[%s2873_s9 + $0x30] sm:$0xff]   ;;  %v1779_v61 = vld [vmem:[%s2873_s9 + $0x38] sm:$0xff]   ;;  %v127_v1 = vld [vmem:[%s2868_s4] sm:$0x3] }
  0x43   :  { %529 = vmatprep.mubr.bf16.mxu1 %v2034_v2  ;;  %782 = vmatprep.mubr.bf16.mxu0 %v2034_v2  ;;  %v2460_v4 = vrot.slane %v127_v1, %v2452_v0  ;;  %v2463_v5 = vrot.slane %v127_v1, %v2457_v3 }
  0x44   :  { %1635 = vmatpush3.bf16.msra.mxu1 %v1769_v51 }
  0x45   :  { %1636 = vmatprep.subr.bf16.mxu1 %v1770_v52 }
  0x48   :  { %1637 = vmatpush3.bf16.msra.mxu1 %v1771_v53 }
  0x49   :  { %1638 = vmatprep.subr.bf16.mxu1 %v1772_v54 }
  0x4a   :  { %1576 = vmatmul.mubr.msk.bf16.gmra.mrb[24].mxu1 %vm199_vm0, %v85_v16  ;;  %1596 = vmatmul.mubr.msk.bf16.gmra.mrb[24].mxu0 %vm199_vm0, %v109_v17 }
  0x4b   :  { %539 = vmatprep.mubr.bf16.mxu1 %v2034_v2  ;;  %792 = vmatprep.mubr.bf16.mxu0 %v2034_v2 }
  0x4c   :  { %1639 = vmatpush3.bf16.msra.mxu1 %v1773_v55 }
  0x4d   :  { %1640 = vmatprep.subr.bf16.mxu1 %v1774_v56 }
  0x50   :  { %1641 = vmatpush3.bf16.msra.mxu1 %v1775_v57 }
  0x51   :  { %1642 = vmatprep.subr.bf16.mxu1 %v1776_v58 }
  0x52   :  { %1577 = vmatmul.mubr.msk.bf16.gmra.mrb[28].mxu1 %vm199_vm0, %v86_v22  ;;  %1597 = vmatmul.mubr.msk.bf16.gmra.mrb[28].mxu0 %vm199_vm0, %v110_v23 }
  0x53   :  { %549 = vmatprep.mubr.bf16.mxu1 %v2034_v2  ;;  %802 = vmatprep.mubr.bf16.mxu0 %v2034_v2 }
  0x54   :  { %1643 = vmatpush3.bf16.msra.mxu1 %v1777_v59 }
  0x55   :  { %1644 = vmatprep.subr.bf16.mxu1 %v1778_v60 }
  0x58   :  { %1645 = vmatpush3.bf16.msra.mxu1 %v1779_v61 }
  0x5a   :  { %1578 = vmatmul.mubr.msk.bf16.gmra.mrb[32].mxu1 %vm199_vm0, %v87_v28  ;;  %1598 = vmatmul.mubr.msk.bf16.gmra.mrb[32].mxu0 %vm199_vm0, %v111_v29 }
  0x5b   :  { %559 = vmatprep.mubr.bf16.mxu1 %v2034_v2  ;;  %812 = vmatprep.mubr.bf16.mxu0 %v2034_v2 }
  0x62   :  { %1579 = vmatmul.mubr.msk.bf16.gmra.mrb[36].mxu1 %vm199_vm0, %v88_v34  ;;  %1599 = vmatmul.mubr.msk.bf16.gmra.mrb[36].mxu0 %vm199_vm0, %v112_v35 }
  0x63   :  { %569 = vmatprep.mubr.bf16.mxu1 %v2034_v2  ;;  %822 = vmatprep.mubr.bf16.mxu0 %v2034_v2 }
  0x6a   :  { %1580 = vmatmul.mubr.msk.bf16.gmra.mrb[40].mxu1 %vm199_vm0, %v89_v40  ;;  %1600 = vmatmul.mubr.msk.bf16.gmra.mrb[40].mxu0 %vm199_vm0, %v113_v41 }
  0x6b   :  { %579 = vmatprep.mubr.bf16.mxu1 %v2034_v2  ;;  %832 = vmatprep.mubr.bf16.mxu0 %v2034_v2 }
  0x72   :  { %1581 = vmatmul.mubr.msk.bf16.gmra.mrb[44].mxu1 %vm199_vm0, %v90_v46  ;;  %1601 = vmatmul.mubr.msk.bf16.gmra.mrb[44].mxu0 %vm199_vm0, %v114_v47 }
  0x73   :  { %1413 = vmatprep.mubr.bf16.mxu0 %v2034_v2 }
  0xed   :  { %v258_v6 = vpop.f32.mrb[0].mxu0  ;;  %v298_v7 = vpop.f32.mrb[0].mxu1 }
  0xee   :  { %v259_v8 = vadd.f32 %v258_v6, %v2460_v4  ;;  %v299_v9 = vadd.f32 %v298_v7, %v2460_v4  ;;  %v260_v10 = vpop.f32.mrb[1].mxu0  ;;  %v300_v11 = vpop.f32.mrb[1].mxu1 }
  0xef   :  { %v261_v12 = vadd.f32 %v260_v10, %v2463_v5  ;;  %v301_v13 = vadd.f32 %v300_v11, %v2463_v5  ;;  %v262_v14 = vpop.f32.mrb[2].mxu0  ;;  %v302_v15 = vpop.f32.mrb[2].mxu1 }
  0xf0   :  { %1786 = vtanh.f32 %v259_v8  ;;  %v263_v16 = vadd.f32 %v262_v14, %v2460_v4  ;;  %v264_v17 = vpop.f32.mrb[3].mxu0  ;;  %v304_v18 = vpop.f32.mrb[3].mxu1  ;;  %v303_v19 = vadd.f32 %v302_v15, %v2460_v4 }
  0xf1   :  { %1788 = vtanh.f32 %v299_v9  ;;  %v265_v20 = vadd.f32 %v264_v17, %v2463_v5  ;;  %v305_v21 = vadd.f32 %v304_v18, %v2463_v5 }
  0xf2   :  { %1790 = vtanh.f32 %v261_v12 }
  0xf3   :  { %1792 = vtanh.f32 %v301_v13 }
  0xf4   :  { %1794 = vtanh.f32 %v263_v16 }
  0xf5   :  { %1796 = vtanh.f32 %v303_v19  ;;  %v268_v22 = vpop.f32.mrb[4].mxu0  ;;  %v308_v23 = vpop.f32.mrb[4].mxu1  ;;  %v381_v19 = vld [vmem:[%s2870_s6] sm:$0x3] }
  0xf6   :  { %1798 = vtanh.f32 %v265_v20  ;;  %v269_v24 = vadd.f32 %v268_v22, %v2460_v4  ;;  %v309_v25 = vadd.f32 %v308_v23, %v2460_v4  ;;  %v270_v26 = vpop.f32.mrb[5].mxu0  ;;  %v310_v27 = vpop.f32.mrb[5].mxu1  ;;  %v634_v20 = vld [vmem:[%s2872_s8] sm:$0x3] }
  0xf7   :  { %1800 = vtanh.f32 %v305_v21  ;;  %v271_v28 = vadd.f32 %v270_v26, %v2463_v5  ;;  %v311_v29 = vadd.f32 %v310_v27, %v2463_v5  ;;  %v272_v30 = vpop.f32.mrb[6].mxu0  ;;  %v312_v31 = vpop.f32.mrb[6].mxu1 }
  0xf8   :  { %1802 = vtanh.f32 %v269_v24  ;;  %v273_v32 = vadd.f32 %v272_v30, %v2460_v4  ;;  %v274_v33 = vpop.f32.mrb[7].mxu0  ;;  %v314_v34 = vpop.f32.mrb[7].mxu1  ;;  %v313_v35 = vadd.f32 %v312_v31, %v2460_v4  ;;  %v2540_v30 = vrot.slane %v634_v20, %v2452_v0 }
  0xf9   :  { %1804 = vtanh.f32 %v309_v25  ;;  %v275_v37 = vadd.f32 %v274_v33, %v2463_v5  ;;  %v315_v39 = vadd.f32 %v314_v34, %v2463_v5  ;;  %v2546_v33 = vrot.slane %v381_v19, %v2457_v3 }
  0xfa   :  { %v2479_v36 = vpop.eup %1786  ;;  %1806 = vtanh.f32 %v271_v28 }
  0xfb   :  { %v2482_v38 = vpop.eup %1788  ;;  %1808 = vtanh.f32 %v311_v29  ;;  %v2537_v29 = vrot.slane %v381_v19, %v2452_v0 }
  0xfc   :  { %v2485_v40 = vpop.eup %1790  ;;  %1810 = vtanh.f32 %v273_v32 }
  0xfd   :  { %v2487_v41 = vpop.eup %1792  ;;  %1812 = vtanh.f32 %v313_v35  ;;  %v278_v42 = vpop.f32.mrb[8].mxu0 }
  0xfe   :  { %v318_v43 = vpop.f32.mrb[8].mxu1  ;;  %v2489_v44 = vpop.eup %1794  ;;  %1814 = vtanh.f32 %v275_v37  ;;  %v279_v45 = vadd.f32 %v278_v42, %v2460_v4 }
  0xff   :  { %v319_v46 = vadd.f32 %v318_v43, %v2460_v4  ;;  %v280_v47 = vpop.f32.mrb[9].mxu0  ;;  %v320_v48 = vpop.f32.mrb[9].mxu1  ;;  %1816 = vtanh.f32 %v315_v39 }
 0x100   :  { %v2493_v49 = vpop.eup %1796  ;;  %v281_v50 = vadd.f32 %v280_v47, %v2463_v5  ;;  %v321_v51 = vadd.f32 %v320_v48, %v2463_v5  ;;  %v282_v52 = vpop.f32.mrb[10].mxu0  ;;  %1818 = vtanh.f32 %v279_v45 }
 0x101   :  { %v322_v53 = vpop.f32.mrb[10].mxu1  ;;  %v2497_v54 = vpop.eup %1798  ;;  %v283_v55 = vadd.f32 %v282_v52, %v2460_v4  ;;  %1820 = vtanh.f32 %v319_v46 }
 0x102   :  { %v284_v56 = vpop.f32.mrb[11].mxu0  ;;  %v324_v57 = vpop.f32.mrb[11].mxu1  ;;  %v323_v59 = vadd.f32 %v322_v53, %v2460_v4  ;;  %1822 = vtanh.f32 %v281_v50 }
 0x103   :  { %v2500_v58 = vpop.eup %1800  ;;  %v285_v61 = vadd.f32 %v284_v56, %v2463_v5  ;;  %1824 = vtanh.f32 %v321_v51  ;;  %v325_v63 = vadd.f32 %v324_v57, %v2463_v5 }
 0x104   :  { %v2503_v60 = vpop.eup %1802  ;;  %1826 = vtanh.f32 %v283_v55 }
 0x105   :  { %v2506_v62 = vpop.eup %1804  ;;  %1828 = vtanh.f32 %v323_v59  ;;  %v288_v7 = vpop.f32.mrb[12].mxu0 }
 0x106   :  { %v2509_v1 = vpop.eup %1806  ;;  %v328_v8 = vpop.f32.mrb[12].mxu1  ;;  %1830 = vtanh.f32 %v285_v61  ;;  %v289_v10 = vadd.f32 %v288_v7, %v2460_v4 }
 0x107   :  { %v2511_v6 = vpop.eup %1808  ;;  %v329_v11 = vadd.f32 %v328_v8, %v2460_v4  ;;  %v290_v12 = vpop.f32.mrb[13].mxu0  ;;  %1832 = vtanh.f32 %v325_v63 }
 0x108   :  { %v2513_v9 = vpop.eup %1810  ;;  %v330_v13 = vpop.f32.mrb[13].mxu1  ;;  %v291_v15 = vadd.f32 %v290_v12, %v2463_v5  ;;  %1834 = vtanh.f32 %v289_v10 }
 0x109   :  { %v2517_v14 = vpop.eup %1812  ;;  %v331_v16 = vadd.f32 %v330_v13, %v2463_v5  ;;  %v292_v17 = vpop.f32.mrb[14].mxu0  ;;  %1836 = vtanh.f32 %v329_v11 }
 0x10a   :  { %v332_v18 = vpop.f32.mrb[14].mxu1  ;;  %v2527_v21 = vpop.eup %1814  ;;  %v293_v22 = vadd.f32 %v292_v17, %v2460_v4  ;;  %1838 = vtanh.f32 %v291_v15 }
 0x10b   :  { %v294_v23 = vpop.f32.mrb[15].mxu0  ;;  %v334_v24 = vpop.f32.mrb[15].mxu1  ;;  %v333_v26 = vadd.f32 %v332_v18, %v2460_v4  ;;  %1840 = vtanh.f32 %v331_v16  ;;  %v2549_v4 = vrot.slane %v634_v20, %v2457_v3 }
 0x10c   :  { %v2530_v25 = vpop.eup %1816  ;;  %v295_v28 = vadd.f32 %v294_v23, %v2463_v5  ;;  %v335_v32 = vadd.f32 %v334_v24, %v2463_v5  ;;  %1842 = vtanh.f32 %v293_v22 }
 0x10d   :  { %v2533_v27 = vpop.eup %1818  ;;  %1844 = vtanh.f32 %v333_v26  ;;  %v511_v37 = vpop.f32.mrb[16].mxu1 }
 0x10e   :  { %v2542_v31 = vpop.eup %1820  ;;  %v764_v0 = vpop.f32.mrb[16].mxu0  ;;  %1846 = vtanh.f32 %v295_v28  ;;  %v512_v42 = vadd.f32 %v511_v37, %v2537_v29 }
 0x10f   :  { %v2551_v34 = vpop.eup %1822  ;;  %v765_v5 = vadd.f32 %v764_v0, %v2540_v30  ;;  %v513_v43 = vpop.f32.mrb[17].mxu1  ;;  %1848 = vtanh.f32 %v335_v32 }
 0x110   :  { %v2553_v35 = vpop.eup %1824  ;;  %v766_v45 = vpop.f32.mrb[17].mxu0  ;;  %v514_v3 = vadd.f32 %v513_v43, %v2546_v33  ;;  %1850 = vtanh.f32 %v512_v42 }
 0x111   :  { %v2555_v39 = vpop.eup %1826  ;;  %v767_v47 = vadd.f32 %v766_v45, %v2549_v4  ;;  %v515_v48 = vpop.f32.mrb[18].mxu1  ;;  %1852 = vtanh.f32 %v765_v5 }
 0x112   :  { %v2559_v46 = vpop.eup %1828  ;;  %v768_v50 = vpop.f32.mrb[18].mxu0  ;;  %v516_v52 = vadd.f32 %v515_v48, %v2537_v29  ;;  %1854 = vtanh.f32 %v514_v3 }
 0x113   :  { %v2563_v51 = vpop.eup %1830  ;;  %v517_v53 = vpop.f32.mrb[19].mxu1  ;;  %v769_v57 = vadd.f32 %v768_v50, %v2540_v30  ;;  %1856 = vtanh.f32 %v767_v47 }
 0x114   :  { %v770_v55 = vpop.f32.mrb[19].mxu0  ;;  %v2566_v56 = vpop.eup %1832  ;;  %v518_v61 = vadd.f32 %v517_v53, %v2546_v33  ;;  %1858 = vtanh.f32 %v516_v52 }
 0x115   :  { %v2569_v59 = vpop.eup %1834  ;;  %v771_v7 = vadd.f32 %v770_v55, %v2549_v4  ;;  %1860 = vtanh.f32 %v769_v57  ;;  %v521_v11 = vpop.f32.mrb[20].mxu1 }
 0x116   :  { %v2572_v63 = vpop.eup %1836  ;;  %v774_v12 = vpop.f32.mrb[20].mxu0  ;;  %1862 = vtanh.f32 %v518_v61  ;;  %v522_v15 = vadd.f32 %v521_v11, %v2537_v29 }
 0x117   :  { %v2575_v8 = vpop.eup %1838  ;;  %v775_v16 = vadd.f32 %v774_v12, %v2540_v30  ;;  %v523_v17 = vpop.f32.mrb[21].mxu1  ;;  %1864 = vtanh.f32 %v771_v7 }
 0x118   :  { %v2577_v10 = vpop.eup %1840  ;;  %v776_v18 = vpop.f32.mrb[21].mxu0  ;;  %v524_v20 = vadd.f32 %v523_v17, %v2546_v33  ;;  %1866 = vtanh.f32 %v522_v15 }
 0x119   :  { %v2579_v13 = vpop.eup %1842  ;;  %v777_v22 = vadd.f32 %v776_v18, %v2549_v4  ;;  %v525_v23 = vpop.f32.mrb[22].mxu1  ;;  %1868 = vtanh.f32 %v775_v16 }
 0x11a   :  { %v2583_v19 = vpop.eup %1844  ;;  %v778_v24 = vpop.f32.mrb[22].mxu0  ;;  %v526_v28 = vadd.f32 %v525_v23, %v2537_v29  ;;  %1870 = vtanh.f32 %v524_v20 }
 0x11b   :  { %v2587_v26 = vpop.eup %1846  ;;  %v527_v32 = vpop.f32.mrb[23].mxu1  ;;  %v779_v42 = vadd.f32 %v778_v24, %v2540_v30  ;;  %1872 = vtanh.f32 %v777_v22 }
 0x11c   :  { %v780_v37 = vpop.f32.mrb[23].mxu0  ;;  %v2590_v0 = vpop.eup %1848  ;;  %v528_v43 = vadd.f32 %v527_v32, %v2546_v33  ;;  %1874 = vtanh.f32 %v526_v28 }
 0x11d   :  { %v1851_v5 = vpop.eup %1850  ;;  %v781_v47 = vadd.f32 %v780_v37, %v2549_v4  ;;  %1876 = vtanh.f32 %v779_v42  ;;  %v531_v53 = vpop.f32.mrb[24].mxu1 }
 0x11e   :  { %v1853_v45 = vpop.eup %1852  ;;  %v875_v3 = vmul.f32 %v1851_v5, %v2479_v36  ;;  %v784_v55 = vpop.f32.mrb[24].mxu0  ;;  %1878 = vtanh.f32 %v528_v43  ;;  %v532_v7 = vadd.f32 %v531_v53, %v2537_v29 }
 0x11f   :  { %v1855_v48 = vpop.eup %1854  ;;  %v533_v11 = vpop.f32.mrb[25].mxu1  ;;  %1880 = vtanh.f32 %v781_v47  ;;  %v785_v18 = vadd.f32 %v784_v55, %v2540_v30 }
 0x120   :  { %v1857_v50 = vpop.eup %1856  ;;  %v2596_v52 = vmul.f32 %v1853_v45, %v875_v3  ;;  %v876_v57 = vmul.f32 %v1855_v48, %v2485_v40  ;;  %v786_v12 = vpop.f32.mrb[25].mxu0  ;;  %v534_v16 = vadd.f32 %v533_v11, %v2546_v33  ;;  %1882 = vtanh.f32 %v532_v7 }
 0x121   :  { %v1859_v61 = vpop.eup %1858  ;;  %v535_v17 = vpop.f32.mrb[26].mxu1 }
 0x122   :  { %v1861_v36 = vpop.eup %1860  ;;  %v877_v15 = vmul.f32 %v1859_v61, %v2489_v44  ;;  %v788_v20 = vpop.f32.mrb[26].mxu0  ;;  %v536_v40 = vadd.f32 %v535_v17, %v2537_v29  ;;  %v908_v28 = vmul.f32 %v1857_v50, %v876_v57  ;;  %1884 = vtanh.f32 %v534_v16 }
 0x123   :  { %v1863_v22 = vpop.eup %1862  ;;  %v537_v23 = vpop.f32.mrb[27].mxu1  ;;  %v787_v44 = vadd.f32 %v786_v12, %v2549_v4  ;;  %v789_v43 = vadd.f32 %v788_v20, %v2540_v30 }
 0x124   :  { %v790_v24 = vpop.f32.mrb[27].mxu0  ;;  %v1865_v32 = vpop.eup %1864  ;;  %v909_v37 = vmul.f32 %v1861_v36, %v877_v15  ;;  %v538_v42 = vadd.f32 %v537_v23, %v2546_v33  ;;  %1886 = vtanh.f32 %v536_v40  ;;  %v878_v45 = vmul.f32 %v1863_v22, %v2497_v54 }
 0x125   :  { %v1867_v5 = vpop.eup %1866  ;;  %1888 = vtanh.f32 %v785_v18  ;;  %v791_v47 = vadd.f32 %v790_v24, %v2549_v4  ;;  %v541_v61 = vpop.f32.mrb[28].mxu1 }
 0x126   :  { %v1869_v3 = vpop.eup %1868  ;;  %v939_v48 = vpack.c.bf16 %v909_v37, %v2596_v52  ;;  %v879_v50 = vmul.f32 %v1867_v5, %v2503_v60  ;;  %1890 = vtanh.f32 %v538_v42  ;;  %v910_v55 = vmul.f32 %v1865_v32, %v878_v45  ;;  %v794_v7 = vpop.f32.mrb[28].mxu0 }
 0x127   :  { %v1871_v53 = vpop.eup %1870  ;;  %1892 = vtanh.f32 %v787_v44  ;;  %v542_v15 = vadd.f32 %v541_v61, %v2537_v29  ;;  %v543_v16 = vpop.f32.mrb[29].mxu1  ;;  %v795_v20 = vadd.f32 %v794_v7, %v2540_v30 }
 0x128   :  { %v1873_v57 = vpop.eup %1872  ;;  %v880_v11 = vmul.f32 %v1871_v53, %v2509_v1  ;;  %v2612_v12 = vmul.f32 %v1869_v3, %v879_v50  ;;  %1894 = vtanh.f32 %v789_v43  ;;  %v940_v36 = vpack.c.bf16 %v910_v55, %v908_v28  ;;  %v796_v52 = vpop.f32.mrb[29].mxu0 }
 0x129   :  { %v1875_v54 = vpop.eup %1874  ;;  %1896 = vtanh.f32 %v791_v47  ;;  %v544_v60 = vadd.f32 %v543_v16, %v2546_v33  ;;  %v545_v18 = vpop.f32.mrb[30].mxu1  ;;  %v797_v44 = vadd.f32 %v796_v52, %v2549_v4 }
 0x12a   :  { %v1877_v17 = vpop.eup %1876  ;;  %v798_v22 = vpop.f32.mrb[30].mxu0  ;;  %v912_v40 = vmul.f32 %v1873_v57, %v880_v11  ;;  %1115 = vmatprep.mubr.bf16.mxu1 %v940_v36  ;;  %1898 = vtanh.f32 %v542_v15  ;;  %v546_v1 = vadd.f32 %v545_v18, %v2537_v29  ;;  %v881_v32 = vmul.f32 %v1875_v54, %v2513_v9 }
 0x12b   :  { %v1879_v23 = vpop.eup %1878  ;;  %v547_v24 = vpop.f32.mrb[31].mxu1  ;;  %1116 = vmatmul.mubr.bf16.vlgmr.msra.gmra.mrb[48].mxu1 %v939_v48  ;;  %1900 = vtanh.f32 %v544_v60  ;;  %v799_v45 = vadd.f32 %v798_v22, %v2540_v30 }
 0x12c   :  { %v800_v28 = vpop.f32.mrb[31].mxu0  ;;  %v1881_v37 = vpop.eup %1880  ;;  %v548_v42 = vadd.f32 %v547_v24, %v2546_v33  ;;  %v882_v5 = vmul.f32 %v1879_v23, %v2527_v21  ;;  %1902 = vtanh.f32 %v546_v1  ;;  %v913_v3 = vmul.f32 %v1877_v17, %v881_v32 }
 0x12d   :  { %v1883_v43 = vpop.eup %1882  ;;  %1904 = vtanh.f32 %v795_v20  ;;  %v801_v50 = vadd.f32 %v800_v28, %v2549_v4  ;;  %v551_v7 = vpop.f32.mrb[32].mxu1 }
 0x12e   :  { %v1885_v47 = vpop.eup %1884  ;;  %v914_v53 = vmul.f32 %v1881_v37, %v882_v5  ;;  %v883_v9 = vmul.f32 %v1883_v43, %v2533_v27  ;;  %1906 = vtanh.f32 %v548_v42  ;;  %v941_v55 = vpack.c.bf16 %v913_v3, %v2612_v12  ;;  %v804_v11 = vpop.f32.mrb[32].mxu0 }
 0x12f   :  { %v1887_v48 = vpop.eup %1886  ;;  %v884_v57 = vmul.f32 %v1885_v47, %v2551_v34  ;;  %1908 = vtanh.f32 %v797_v44  ;;  %v552_v15 = vadd.f32 %v551_v7, %v2537_v29  ;;  %v553_v16 = vpop.f32.mrb[33].mxu1  ;;  %v805_v60 = vadd.f32 %v804_v11, %v2540_v30 }
 0x130   :  { %v1889_v61 = vpop.eup %1888  ;;  %v942_v21 = vpack.c.bf16 %v914_v53, %v912_v40  ;;  %v885_v54 = vmul.f32 %v1887_v48, %v2555_v39  ;;  %1910 = vtanh.f32 %v799_v45  ;;  %v806_v52 = vpop.f32.mrb[33].mxu0  ;;  %v554_v12 = vadd.f32 %v553_v16, %v2546_v33 }
 0x131   :  { %v1891_v36 = vpop.eup %1890  ;;  %v915_v27 = vmul.f32 %v1889_v61, %v883_v9  ;;  %1912 = vtanh.f32 %v801_v50  ;;  %v555_v34 = vpop.f32.mrb[34].mxu1  ;;  %v807_v32 = vadd.f32 %v806_v52, %v2549_v4 }
 0x132   :  { %v1893_v17 = vpop.eup %1892  ;;  %1123 = vmatprep.mubr.bf16.mxu1 %v942_v21  ;;  %v808_v18 = vpop.f32.mrb[34].mxu0  ;;  %v886_v20 = vmul.f32 %v1891_v36, %v2563_v51  ;;  %1914 = vtanh.f32 %v552_v15  ;;  %v556_v39 = vadd.f32 %v555_v34, %v2537_v29 }
 0x133   :  { %v1895_v22 = vpop.eup %1894  ;;  %v557_v40 = vpop.f32.mrb[35].mxu1  ;;  %v916_v1 = vmul.f32 %v1893_v17, %v884_v57  ;;  %1124 = vmatmul.mubr.bf16.gmra.mrb[52].mxu1 %v941_v55  ;;  %1916 = vtanh.f32 %v554_v12  ;;  %v809_v44 = vadd.f32 %v808_v18, %v2540_v30 }
 0x134   :  { %v810_v23 = vpop.f32.mrb[35].mxu0  ;;  %v1897_v24 = vpop.eup %1896  ;;  %v558_v28 = vadd.f32 %v557_v40, %v2546_v33  ;;  %v917_v37 = vmul.f32 %v1895_v22, %v885_v54  ;;  %1918 = vtanh.f32 %v556_v39 }
 0x135   :  { %v1899_v42 = vpop.eup %1898  ;;  %v918_v51 = vmul.f32 %v1897_v24, %v886_v20  ;;  %1920 = vtanh.f32 %v805_v60  ;;  %v811_v43 = vadd.f32 %v810_v23, %v2549_v4  ;;  %v561_v48 = vpop.f32.mrb[36].mxu1 }
 0x136   :  { %v1901_v5 = vpop.eup %1900  ;;  %v943_v45 = vpack.c.bf16 %v917_v37, %v915_v27  ;;  %v887_v3 = vmul.f32 %v1899_v42, %v2569_v59  ;;  %1922 = vtanh.f32 %v558_v28  ;;  %v814_v55 = vpop.f32.mrb[36].mxu0  ;;  %v562_v21 = vadd.f32 %v561_v48, %v2537_v29 }
 0x137   :  { %v1903_v47 = vpop.eup %1902  ;;  %v944_v50 = vpack.c.bf16 %v918_v51, %v916_v1  ;;  %v888_v53 = vmul.f32 %v1901_v5, %v2575_v8  ;;  %1924 = vtanh.f32 %v807_v32  ;;  %v563_v7 = vpop.f32.mrb[37].mxu1  ;;  %v815_v8 = vadd.f32 %v814_v55, %v2540_v30 }
 0x138   :  { %v1905_v9 = vpop.eup %1904  ;;  %v889_v57 = vmul.f32 %v1903_v47, %v2579_v13  ;;  %1926 = vtanh.f32 %v809_v44  ;;  %v816_v11 = vpop.f32.mrb[37].mxu0  ;;  %v564_v36 = vadd.f32 %v563_v7, %v2546_v33 }
 0x139   :  { %v1907_v61 = vpop.eup %1906  ;;  %1131 = vmatprep.mubr.bf16.mxu1 %v944_v50  ;;  %v919_v54 = vmul.f32 %v1905_v9, %v887_v3  ;;  %1928 = vtanh.f32 %v811_v43  ;;  %v565_v15 = vpop.f32.mrb[38].mxu1  ;;  %v817_v20 = vadd.f32 %v816_v11, %v2549_v4 }
 0x13a   :  { %v1909_v59 = vpop.eup %1908  ;;  %v818_v16 = vpop.f32.mrb[38].mxu0  ;;  %v890_v52 = vmul.f32 %v1907_v61, %v2587_v26  ;;  %1930 = vtanh.f32 %v562_v21  ;;  %v566_v13 = vadd.f32 %v565_v15, %v2537_v29 }
 0x13b   :  { %v1911_v27 = vpop.eup %1910  ;;  %v567_v17 = vpop.f32.mrb[39].mxu1  ;;  %v920_v34 = vmul.f32 %v1909_v59, %v888_v53  ;;  %1132 = vmatmul.mubr.bf16.gmra.mrb[56].mxu1 %v943_v45  ;;  %1932 = vtanh.f32 %v564_v36  ;;  %v819_v40 = vadd.f32 %v818_v16, %v2540_v30 }
 0x13c   :  { %v820_v12 = vpop.f32.mrb[39].mxu0  ;;  %v1913_v60 = vpop.eup %1912  ;;  %v568_v18 = vadd.f32 %v567_v17, %v2546_v33  ;;  %v921_v22 = vmul.f32 %v1911_v27, %v889_v57  ;;  %1934 = vtanh.f32 %v566_v13 }
 0x13d   :  { %v1915_v39 = vpop.eup %1914  ;;  %v922_v26 = vmul.f32 %v1913_v60, %v890_v52  ;;  %1936 = vtanh.f32 %v815_v8  ;;  %v821_v1 = vadd.f32 %v820_v12, %v2549_v4  ;;  %v571_v51 = vpop.f32.mrb[40].mxu1 }
 0x13e   :  { %v1917_v23 = vpop.eup %1916  ;;  %v945_v24 = vpack.c.bf16 %v921_v22, %v919_v54  ;;  %v891_v28 = vmul.f32 %v1915_v39, %v2482_v38  ;;  %1938 = vtanh.f32 %v568_v18  ;;  %v824_v5 = vpop.f32.mrb[40].mxu0  ;;  %v572_v3 = vadd.f32 %v571_v51, %v2537_v29 }
 0x13f   :  { %v1919_v32 = vpop.eup %1918  ;;  %v946_v37 = vpack.c.bf16 %v922_v26, %v920_v34  ;;  %v892_v42 = vmul.f32 %v1917_v23, %v2487_v41  ;;  %1940 = vtanh.f32 %v817_v20  ;;  %v573_v47 = vpop.f32.mrb[41].mxu1  ;;  %v825_v41 = vadd.f32 %v824_v5, %v2540_v30 }
 0x140   :  { %v1921_v44 = vpop.eup %1920  ;;  %v893_v43 = vmul.f32 %v1919_v32, %v2493_v49  ;;  %1942 = vtanh.f32 %v819_v40  ;;  %v826_v50 = vpop.f32.mrb[41].mxu0  ;;  %v574_v9 = vadd.f32 %v573_v47, %v2546_v33 }
 0x141   :  { %v1923_v45 = vpop.eup %1922  ;;  %1139 = vmatprep.mubr.bf16.mxu1 %v946_v37  ;;  %v923_v53 = vmul.f32 %v1921_v44, %v891_v28  ;;  %1944 = vtanh.f32 %v821_v1  ;;  %v575_v48 = vpop.f32.mrb[42].mxu1  ;;  %v827_v36 = vadd.f32 %v826_v50, %v2549_v4 }
 0x142   :  { %v1925_v38 = vpop.eup %1924  ;;  %v828_v55 = vpop.f32.mrb[42].mxu0  ;;  %v894_v57 = vmul.f32 %v1923_v45, %v2500_v58  ;;  %1946 = vtanh.f32 %v572_v3  ;;  %v576_v49 = vadd.f32 %v575_v48, %v2537_v29 }
 0x143   :  { %v1927_v61 = vpop.eup %1926  ;;  %v577_v21 = vpop.f32.mrb[43].mxu1  ;;  %v924_v11 = vmul.f32 %v1925_v38, %v892_v42  ;;  %1140 = vmatmul.mubr.bf16.gmra.mrb[60].mxu1 %v945_v24  ;;  %1948 = vtanh.f32 %v574_v9  ;;  %v829_v16 = vadd.f32 %v828_v55, %v2540_v30 }
 0x144   :  { %v830_v7 = vpop.f32.mrb[43].mxu0  ;;  %v1929_v54 = vpop.eup %1928  ;;  %v578_v59 = vadd.f32 %v577_v21, %v2546_v33  ;;  %v925_v15 = vmul.f32 %v1927_v61, %v893_v43  ;;  %1950 = vtanh.f32 %v576_v49 }
 0x145   :  { %v1931_v8 = vpop.eup %1930  ;;  %v926_v58 = vmul.f32 %v1929_v54, %v894_v57  ;;  %1952 = vtanh.f32 %v825_v41  ;;  %v831_v27 = vadd.f32 %v830_v7, %v2549_v4  ;;  %v581_v20 = vpop.f32.mrb[44].mxu1 }
 0x146   :  { %v1933_v52 = vpop.eup %1932  ;;  %v947_v13 = vpack.c.bf16 %v925_v15, %v923_v53  ;;  %v895_v17 = vmul.f32 %v1931_v8, %v2506_v62  ;;  %1954 = vtanh.f32 %v578_v59  ;;  %v834_v22 = vpop.f32.mrb[44].mxu0  ;;  %v582_v26 = vadd.f32 %v581_v20, %v2537_v29 }
 0x147   :  { %v1935_v12 = vpop.eup %1934  ;;  %v948_v34 = vpack.c.bf16 %v926_v58, %v924_v11  ;;  %v896_v60 = vmul.f32 %v1933_v52, %v2511_v6  ;;  %1956 = vtanh.f32 %v827_v36  ;;  %v583_v23 = vpop.f32.mrb[45].mxu1  ;;  %v835_v6 = vadd.f32 %v834_v22, %v2540_v30 }
 0x148   :  { %v1937_v18 = vpop.eup %1936  ;;  %v897_v39 = vmul.f32 %v1935_v12, %v2517_v14  ;;  %1958 = vtanh.f32 %v829_v16  ;;  %v836_v1 = vpop.f32.mrb[45].mxu0  ;;  %v584_v28 = vadd.f32 %v583_v23, %v2546_v33 }
 0x149   :  { %v1939_v40 = vpop.eup %1938  ;;  %1147 = vmatprep.mubr.bf16.mxu1 %v948_v34  ;;  %v927_v24 = vmul.f32 %v1937_v18, %v895_v17  ;;  %1960 = vtanh.f32 %v831_v27  ;;  %v585_v32 = vpop.f32.mrb[46].mxu1  ;;  %v837_v47 = vadd.f32 %v836_v1, %v2549_v4 }
 0x14a   :  { %v1941_v62 = vpop.eup %1940  ;;  %v838_v37 = vpop.f32.mrb[46].mxu0  ;;  %v898_v42 = vmul.f32 %v1939_v40, %v2530_v25  ;;  %1962 = vtanh.f32 %v582_v26  ;;  %v586_v14 = vadd.f32 %v585_v32, %v2537_v29  ;;  %v1783_v26 = vld [vmem:[%s2875_s11 + $0x10] ss:$8 sps:$4 sm:$0xff]  }
 0x14b   :  { %v1943_v44 = vpop.eup %1942  ;;  %v587_v51 = vpop.f32.mrb[47].mxu1  ;;  %v928_v43 = vmul.f32 %v1941_v62, %v896_v60  ;;  %1148 = vmatmul.mubr.bf16.gmra.mrb[64].mxu1 %v947_v13  ;;  %1964 = vtanh.f32 %v584_v28  ;;  %v839_v38 = vadd.f32 %v838_v37, %v2540_v30 }
 0x14c   :  { %v840_v5 = vpop.f32.mrb[47].mxu0  ;;  %v1945_v45 = vpop.eup %1944  ;;  %v588_v3 = vadd.f32 %v587_v51, %v2546_v33  ;;  %v929_v50 = vmul.f32 %v1943_v44, %v897_v39  ;;  %1966 = vtanh.f32 %v586_v14 }
 0x14d   :  { %v1947_v53 = vpop.eup %1946  ;;  %v930_v25 = vmul.f32 %v1945_v45, %v898_v42  ;;  %1968 = vtanh.f32 %v835_v6  ;;  %v841_v29 = vadd.f32 %v840_v5, %v2549_v4 }
 0x14e   :  { %v1949_v9 = vpop.eup %1948  ;;  %v949_v48 = vpack.c.bf16 %v929_v50, %v927_v24  ;;  %v899_v41 = vmul.f32 %v1947_v53, %v2542_v31  ;;  %1970 = vtanh.f32 %v588_v3 }
 0x14f   :  { %v1951_v55 = vpop.eup %1950  ;;  %v950_v57 = vpack.c.bf16 %v930_v25, %v928_v43  ;;  %v900_v33 = vmul.f32 %v1949_v9, %v2553_v35  ;;  %1972 = vtanh.f32 %v837_v47 }
 0x150   :  { %v1953_v61 = vpop.eup %1952  ;;  %v901_v49 = vmul.f32 %v1951_v55, %v2559_v46  ;;  %1974 = vtanh.f32 %v839_v38 }
 0x151   :  { %v1955_v21 = vpop.eup %1954  ;;  %1155 = vmatprep.mubr.bf16.mxu1 %v950_v57  ;;  %v931_v30 = vmul.f32 %v1953_v61, %v899_v41  ;;  %1976 = vtanh.f32 %v841_v29 }
 0x152   :  { %v1957_v7 = vpop.eup %1956  ;;  %v902_v4 = vmul.f32 %v1955_v21, %v2566_v56 }
 0x153   :  { %v1959_v11 = vpop.eup %1958  ;;  %v932_v54 = vmul.f32 %v1957_v7, %v900_v33  ;;  %1156 = vmatmul.mubr.bf16.gmra.mrb[68].mxu1 %v949_v48 }
 0x154   :  { %v1961_v31 = vpop.eup %1960  ;;  %v933_v59 = vmul.f32 %v1959_v11, %v901_v49 }
 0x155   :  { %v1963_v36 = vpop.eup %1962  ;;  %v934_v15 = vmul.f32 %v1961_v31, %v902_v4 }
 0x156   :  { %v1965_v35 = vpop.eup %1964  ;;  %v951_v8 = vpack.c.bf16 %v933_v59, %v931_v30  ;;  %v903_v16 = vmul.f32 %v1963_v36, %v2572_v63 }
 0x157   :  { %v1967_v46 = vpop.eup %1966  ;;  %v952_v58 = vpack.c.bf16 %v934_v15, %v932_v54  ;;  %v904_v52 = vmul.f32 %v1965_v35, %v2577_v10  ;;  %v1780_v10 = vld [vmem:[%s2875_s11] ss:$8 sps:$4 sm:$0xff]  }
 0x158   :  { %v1969_v27 = vpop.eup %1968  ;;  %v905_v13 = vmul.f32 %v1967_v46, %v2583_v19  ;;  %v1782_v19 = vld [vmem:[%s2875_s11 + $0x4] ss:$8 sps:$4 sm:$0xff]  }
 0x159   :  { %v1971_v17 = vpop.eup %1970  ;;  %1163 = vmatprep.mubr.bf16.mxu1 %v952_v58  ;;  %v935_v56 = vmul.f32 %v1969_v27, %v903_v16  ;;  %1381 = vmatprep.subr.bf16.mxu0 %v1782_v19 }
 0x15a   :  { %v1973_v12 = vpop.eup %1972  ;;  %v906_v34 = vmul.f32 %v1971_v17, %v2590_v0  ;;  %v1785_v0 = vld [vmem:[%s2875_s11 + $0x14] ss:$8 sps:$4 sm:$0xff]   ;;  %1382 = vmatpush1.bf16.msra.mxu0 %v1780_v10 }
 0x15b   :  { %v1975_v60 = vpop.eup %1974  ;;  %v936_v18 = vmul.f32 %v1973_v12, %v904_v52  ;;  %1164 = vmatmul.mubr.bf16.gmra.mrb[72].mxu1 %v951_v8  ;;  %1383 = vmatprep.subr.bf16.mxu0 %v1785_v0 }
 0x15c   :  { %v1977_v20 = vpop.eup %1976  ;;  %v937_v22 = vmul.f32 %v1975_v60, %v905_v13 }
 0x15d   :  { %v938_v39 = vmul.f32 %v1977_v20, %v906_v34 }
 0x15e   :  { %v953_v63 = vpack.c.bf16 %v937_v22, %v935_v56  ;;  %1384 = vmatpush1.bf16.msra.mxu0 %v1783_v26 }
 0x15f   :  { %v954_v40 = vpack.c.bf16 %v938_v39, %v936_v18 }
 0x161   :  { %1171 = vmatprep.mubr.bf16.mxu1 %v954_v40 }
 0x163   :  { %1172 = vmatmul.mubr.bf16.gmra.mrb[76].mxu1 %v953_v63 }
 0x1fe   :  { %v1646_v23 = vpop.f32.mrb[48].mxu1 }
 0x1ff   :  { %v1647_v1 = vpop.f32.mrb[49].mxu1 }
 0x200   :  { %v2693_v24 = vadd.f32 %v1647_v1, %v1646_v23  ;;  %v1649_v62 = vpop.f32.mrb[50].mxu1 }
 0x201   :  { %v1650_v28 = vpop.f32.mrb[51].mxu1 }
 0x202   :  { %v2695_v32 = vadd.f32 %v1650_v28, %v1649_v62  ;;  %v1180_v6 = vmul.f32 %v2693_v24, %v2693_v24 }
 0x204   :  { %v1197_v37 = vsel %vm1196_vm1, %v1180_v6, 0.0  ;;  %v1181_v42 = vmul.f32 %v2695_v32, %v2695_v32 }
 0x205   :  { %1198 = vadd.xlane.f32.xlu0 %v1197_v37 }
 0x206   :  { %v1652_v44 = vpop.f32.mrb[52].mxu1  ;;  %v1200_v43 = vsel %vm1196_vm1, %v1181_v42, 0.0 }
 0x207   :  { %v1653_v14 = vpop.f32.mrb[53].mxu1 }
 0x208   :  { %v2702_v51 = vadd.f32 %v1653_v14, %v1652_v44  ;;  %v1655_v5 = vpop.f32.mrb[54].mxu1 }
 0x209   :  { %v1656_v45 = vpop.f32.mrb[55].mxu1  ;;  %1201 = vadd.xlane.f32.xlu0 %v1200_v43 }
 0x20a   :  { %v2705_v3 = vadd.f32 %v1656_v45, %v1655_v5  ;;  %v1182_v47 = vmul.f32 %v2702_v51, %v2702_v51 }
 0x20c   :  { %v1203_v50 = vsel %vm1196_vm1, %v1182_v47, 0.0  ;;  %v1183_v53 = vmul.f32 %v2705_v3, %v2705_v3 }
 0x20d   :  { %1204 = vadd.xlane.f32.xlu1 %v1203_v50 }
 0x20e   :  { %v1658_v38 = vpop.f32.mrb[56].mxu1  ;;  %v1206_v48 = vsel %vm1196_vm1, %v1183_v53, 0.0 }
 0x20f   :  { %v1659_v25 = vpop.f32.mrb[57].mxu1 }
 0x210   :  { %v2712_v9 = vadd.f32 %v1659_v25, %v1658_v38  ;;  %v1661_v29 = vpop.f32.mrb[58].mxu1 }
 0x211   :  { %v1662_v41 = vpop.f32.mrb[59].mxu1  ;;  %1207 = vadd.xlane.f32.xlu1 %v1206_v48 }
 0x212   :  { %v2715_v55 = vadd.f32 %v1662_v41, %v1661_v29  ;;  %v1184_v57 = vmul.f32 %v2712_v9, %v2712_v9 }
 0x214   :  { %v1209_v33 = vsel %vm1196_vm1, %v1184_v57, 0.0  ;;  %v1185_v61 = vmul.f32 %v2715_v55, %v2715_v55 }
 0x215   :  { %1210 = vadd.xlane.f32.xlu0 %v1209_v33 }
 0x216   :  { %v1664_v49 = vpop.f32.mrb[60].mxu1  ;;  %v1212_v21 = vsel %vm1196_vm1, %v1185_v61, 0.0 }
 0x217   :  { %v1665_v30 = vpop.f32.mrb[61].mxu1  ;;  %1213 = vadd.xlane.f32.xlu1 %v1212_v21 }
 0x218   :  { %v2723_v7 = vadd.f32 %v1665_v30, %v1664_v49  ;;  %v1667_v4 = vpop.f32.mrb[62].mxu1 }
 0x219   :  { %v1668_v11 = vpop.f32.mrb[63].mxu1 }
 0x21a   :  { %v2725_v54 = vadd.f32 %v1668_v11, %v1667_v4  ;;  %v1186_v31 = vmul.f32 %v2723_v7, %v2723_v7 }
 0x21c   :  { %v1215_v59 = vsel %vm1196_vm1, %v1186_v31, 0.0  ;;  %v1187_v36 = vmul.f32 %v2725_v54, %v2725_v54 }
 0x21d   :  { %1216 = vadd.xlane.f32.xlu0 %v1215_v59  ;;  %v1293_v59 = vld [vmem:[%s2874_s10] sm:$0xff] }
 0x21e   :  { %v1670_v15 = vpop.f32.mrb[64].mxu1  ;;  %v1218_v35 = vsel %vm1196_vm1, %v1187_v36, 0.0  ;;  %v1294_v36 = vld [vmem:[%s2874_s10 + $0x8] sm:$0xff] }
 0x21f   :  { %v1671_v8 = vpop.f32.mrb[65].mxu1  ;;  %1219 = vadd.xlane.f32.xlu1 %v1218_v35 }
 0x220   :  { %v2733_v16 = vadd.f32 %v1671_v8, %v1670_v15  ;;  %v1673_v46 = vpop.f32.mrb[66].mxu1 }
 0x221   :  { %v1674_v58 = vpop.f32.mrb[67].mxu1 }
 0x222   :  { %v2735_v52 = vadd.f32 %v1674_v58, %v1673_v46  ;;  %v1188_v27 = vmul.f32 %v2733_v16, %v2733_v16 }
 0x224   :  { %v1221_v13 = vsel %vm1196_vm1, %v1188_v27, 0.0  ;;  %v1189_v17 = vmul.f32 %v2735_v52, %v2735_v52 }
 0x225   :  { %1222 = vadd.xlane.f32.xlu0 %v1221_v13 }
 0x226   :  { %v1676_v56 = vpop.f32.mrb[68].mxu1  ;;  %v1224_v12 = vsel %vm1196_vm1, %v1189_v17, 0.0 }
 0x227   :  { %v1677_v34 = vpop.f32.mrb[69].mxu1  ;;  %1225 = vadd.xlane.f32.xlu1 %v1224_v12 }
 0x228   :  { %v2743_v60 = vadd.f32 %v1677_v34, %v1676_v56  ;;  %v1679_v18 = vpop.f32.mrb[70].mxu1 }
 0x229   :  { %v1680_v20 = vpop.f32.mrb[71].mxu1 }
 0x22a   :  { %v2745_v22 = vadd.f32 %v1680_v20, %v1679_v18  ;;  %v1190_v39 = vmul.f32 %v2743_v60, %v2743_v60  ;;  %v1296_v18 = vld [vmem:[%s2874_s10 + $0x18] sm:$0xff] }
 0x22c   :  { %v1227_v63 = vsel %vm1196_vm1, %v1190_v39, 0.0  ;;  %v1191_v40 = vmul.f32 %v2745_v22, %v2745_v22 }
 0x22d   :  { %1228 = vadd.xlane.f32.xlu0 %v1227_v63 }
 0x22e   :  { %v1682_v10 = vpop.f32.mrb[72].mxu1  ;;  %v1230_v19 = vsel %vm1196_vm1, %v1191_v40, 0.0 }
 0x22f   :  { %v1683_v0 = vpop.f32.mrb[73].mxu1  ;;  %1231 = vadd.xlane.f32.xlu1 %v1230_v19 }
 0x230   :  { %v2753_v26 = vadd.f32 %v1683_v0, %v1682_v10  ;;  %v1685_v23 = vpop.f32.mrb[74].mxu1 }
 0x231   :  { %v1686_v1 = vpop.f32.mrb[75].mxu1 }
 0x232   :  { %v2755_v62 = vadd.f32 %v1686_v1, %v1685_v23  ;;  %v1192_v28 = vmul.f32 %v2753_v26, %v2753_v26  ;;  %v1298_v23 = vld [vmem:[%s2874_s10 + $0x28] sm:$0xff] }
 0x234   :  { %v1233_v6 = vsel %vm1196_vm1, %v1192_v28, 0.0  ;;  %v1193_v37 = vmul.f32 %v2755_v62, %v2755_v62 }
 0x235   :  { %1234 = vadd.xlane.f32.xlu0 %v1233_v6 }
 0x236   :  { %v1688_v42 = vpop.f32.mrb[76].mxu1  ;;  %v1236_v44 = vsel %vm1196_vm1, %v1193_v37, 0.0  ;;  %v1297_v37 = vld [vmem:[%s2874_s10 + $0x20] sm:$0xff] }
 0x237   :  { %v1689_v14 = vpop.f32.mrb[77].mxu1  ;;  %1237 = vadd.xlane.f32.xlu1 %v1236_v44 }
 0x238   :  { %v2763_v5 = vadd.f32 %v1689_v14, %v1688_v42  ;;  %v1691_v43 = vpop.f32.mrb[78].mxu1 }
 0x239   :  { %v1692_v45 = vpop.f32.mrb[79].mxu1 }
 0x23a   :  { %v2765_v47 = vadd.f32 %v1692_v45, %v1691_v43  ;;  %v1194_v50 = vmul.f32 %v2763_v5, %v2763_v5 }
 0x23c   :  { %v1239_v53 = vsel %vm1196_vm1, %v1194_v50, 0.0  ;;  %v1195_v38 = vmul.f32 %v2765_v47, %v2765_v47 }
 0x23d   :  { %1240 = vadd.xlane.f32.xlu0 %v1239_v53 }
 0x23e   :  { %v1242_v25 = vsel %vm1196_vm1, %v1195_v38, 0.0 }
 0x23f   :  { %1243 = vadd.xlane.f32.xlu1 %v1242_v25 }
 0x292   :  { %v1199_v29 = vpop.xlane.xlu0 %1198 }
 0x293   :  { %v1245_v48 = vmax.f32 %v1199_v29, 1e-24 }
 0x295   :  { %1978 = vrsqrt.f32 %v1245_v48  ;;  %v1299_v48 = vld [vmem:[%s2874_s10 + $0x30] sm:$0xff] }
 0x296   :  { %v1202_v41 = vpop.xlane.xlu0 %1201 }
 0x297   :  { %v1246_v57 = vmax.f32 %v1202_v41, 1e-24 }
 0x299   :  { %1980 = vrsqrt.f32 %v1246_v57 }
 0x29a   :  { %v1205_v33 = vpop.xlane.xlu1 %1204 }
 0x29b   :  { %v1247_v61 = vmax.f32 %v1205_v33, 1e-24 }
 0x29d   :  { %1982 = vrsqrt.f32 %v1247_v61 }
 0x29e   :  { %v1208_v49 = vpop.xlane.xlu1 %1207 }
 0x29f   :  { %v1979_v21 = vpop.eup %1978  ;;  %v1248_v30 = vmax.f32 %v1208_v49, 1e-24 }
 0x2a0   :  { %v1277_v4 = vmul.f32 %v1979_v21, %v2693_v24 }
 0x2a1   :  { %1984 = vrsqrt.f32 %v1248_v30 }
 0x2a2   :  { %v1211_v11 = vpop.xlane.xlu0 %1210  ;;  %v1309_v58 = vmul.f32 %v1293_v59, %v1277_v4  ;;  %v1301_v59 = vld [vmem:[%s2874_s10 + $0x40] sm:$0xff] }
 0x2a3   :  { %v1981_v31 = vpop.eup %1980  ;;  %v1249_v15 = vmax.f32 %v1211_v11, 1e-24 }
 0x2a4   :  { %v1278_v35 = vmul.f32 %v1981_v31, %v2695_v32  ;;  %v1214_v8 = vpop.xlane.xlu1 %1213  ;;  %v1295_v32 = vld [vmem:[%s2874_s10 + $0x10] sm:$0xff] }
 0x2a5   :  { %1986 = vrsqrt.f32 %v1249_v15  ;;  %v1250_v46 = vmax.f32 %v1214_v8, 1e-24 }
 0x2a6   :  { %v1310_v27 = vmul.f32 %v1294_v36, %v1278_v35 }
 0x2a7   :  { %v1983_v13 = vpop.eup %1982  ;;  %1988 = vrsqrt.f32 %v1250_v46 }
 0x2a8   :  { %v1325_v24 = vpack.c.bf16 %v1310_v27, %v1309_v58  ;;  %v1279_v56 = vmul.f32 %v1983_v13, %v2702_v51 }
 0x2aa   :  { %1622 = vmatmul.mubr.msk.bf16.vlgmr.msra.gmra.mrb[48].mxu0 %vm1196_vm1, %v1325_v24  ;;  %v1217_v17 = vpop.xlane.xlu0 %1216  ;;  %v1311_v40 = vmul.f32 %v1295_v32, %v1279_v56  ;;  %v1303_v56 = vld [vmem:[%s2874_s10 + $0x50] sm:$0xff] }
 0x2ab   :  { %v1985_v12 = vpop.eup %1984  ;;  %v1251_v34 = vmax.f32 %v1217_v17, 1e-24  ;;  %1423 = vmatprep.mubr.bf16.mxu0 %v2034_v2 }
 0x2ac   :  { %v1220_v20 = vpop.xlane.xlu1 %1219  ;;  %v1280_v39 = vmul.f32 %v1985_v12, %v2705_v3 }
 0x2ad   :  { %1990 = vrsqrt.f32 %v1251_v34  ;;  %v1252_v63 = vmax.f32 %v1220_v20, 1e-24 }
 0x2ae   :  { %v1312_v10 = vmul.f32 %v1296_v18, %v1280_v39 }
 0x2af   :  { %v1987_v51 = vpop.eup %1986  ;;  %1992 = vrsqrt.f32 %v1252_v63 }
 0x2b0   :  { %v1326_v19 = vpack.c.bf16 %v1312_v10, %v1311_v40  ;;  %v1281_v28 = vmul.f32 %v1987_v51, %v2712_v9  ;;  %v1300_v9 = vld [vmem:[%s2874_s10 + $0x38] sm:$0xff]  ;;  %v1305_v10 = vld [vmem:[%s2874_s10 + $0x60] sm:$0xff] }
 0x2b1   :  { %v1989_v0 = vpop.eup %1988 }
 0x2b2   :  { %1623 = vmatmul.mubr.msk.bf16.gmra.mrb[52].mxu0 %vm1196_vm1, %v1326_v19  ;;  %v1223_v1 = vpop.xlane.xlu0 %1222  ;;  %v1282_v6 = vmul.f32 %v1989_v0, %v2715_v55  ;;  %v1313_v43 = vmul.f32 %v1297_v37, %v1281_v28  ;;  %v1308_v28 = vld [vmem:[%s2874_s10 + $0x78] sm:$0xff] }
 0x2b3   :  { %v1253_v3 = vmax.f32 %v1223_v1, 1e-24  ;;  %1433 = vmatprep.mubr.bf16.mxu0 %v2034_v2 }
 0x2b4   :  { %v1226_v42 = vpop.xlane.xlu1 %1225  ;;  %v1314_v44 = vmul.f32 %v1298_v23, %v1282_v6 }
 0x2b5   :  { %1994 = vrsqrt.f32 %v1253_v3  ;;  %v1254_v14 = vmax.f32 %v1226_v42, 1e-24 }
 0x2b6   :  { %v1327_v50 = vpack.c.bf16 %v1314_v44, %v1313_v43 }
 0x2b7   :  { %v1991_v45 = vpop.eup %1990  ;;  %1996 = vrsqrt.f32 %v1254_v14 }
 0x2b8   :  { %v1283_v38 = vmul.f32 %v1991_v45, %v2723_v7  ;;  %v1302_v7 = vld [vmem:[%s2874_s10 + $0x48] sm:$0xff] }
 0x2b9   :  { %v1993_v53 = vpop.eup %1992 }
 0x2ba   :  { %1624 = vmatmul.mubr.msk.bf16.gmra.mrb[56].mxu0 %vm1196_vm1, %v1327_v50  ;;  %v1229_v55 = vpop.xlane.xlu0 %1228  ;;  %v1284_v25 = vmul.f32 %v1993_v53, %v2725_v54  ;;  %v1315_v61 = vmul.f32 %v1299_v48, %v1283_v38 }
 0x2bb   :  { %v1255_v29 = vmax.f32 %v1229_v55, 1e-24  ;;  %1443 = vmatprep.mubr.bf16.mxu0 %v2034_v2 }
 0x2bc   :  { %v1232_v41 = vpop.xlane.xlu1 %1231  ;;  %v1316_v57 = vmul.f32 %v1300_v9, %v1284_v25 }
 0x2bd   :  { %1998 = vrsqrt.f32 %v1255_v29  ;;  %v1256_v33 = vmax.f32 %v1232_v41, 1e-24 }
 0x2be   :  { %v1328_v21 = vpack.c.bf16 %v1316_v57, %v1315_v61 }
 0x2bf   :  { %v1995_v49 = vpop.eup %1994  ;;  %2000 = vrsqrt.f32 %v1256_v33 }
 0x2c0   :  { %v1285_v4 = vmul.f32 %v1995_v49, %v2733_v16  ;;  %v1304_v16 = vld [vmem:[%s2874_s10 + $0x58] sm:$0xff] }
 0x2c1   :  { %v1997_v30 = vpop.eup %1996 }
 0x2c2   :  { %1625 = vmatmul.mubr.msk.bf16.gmra.mrb[60].mxu0 %vm1196_vm1, %v1328_v21  ;;  %v1235_v54 = vpop.xlane.xlu0 %1234  ;;  %v1286_v11 = vmul.f32 %v1997_v30, %v2735_v52  ;;  %v1317_v8 = vmul.f32 %v1301_v59, %v1285_v4 }
 0x2c3   :  { %v1257_v31 = vmax.f32 %v1235_v54, 1e-24  ;;  %1453 = vmatprep.mubr.bf16.mxu0 %v2034_v2 }
 0x2c4   :  { %v1238_v36 = vpop.xlane.xlu1 %1237  ;;  %v1318_v15 = vmul.f32 %v1302_v7, %v1286_v11 }
 0x2c5   :  { %2002 = vrsqrt.f32 %v1257_v31  ;;  %v1258_v35 = vmax.f32 %v1238_v36, 1e-24 }
 0x2c6   :  { %v1329_v58 = vpack.c.bf16 %v1318_v15, %v1317_v8 }
 0x2c7   :  { %v1999_v46 = vpop.eup %1998  ;;  %2004 = vrsqrt.f32 %v1258_v35 }
 0x2c8   :  { %v1287_v13 = vmul.f32 %v1999_v46, %v2743_v60  ;;  %v1306_v60 = vld [vmem:[%s2874_s10 + $0x68] sm:$0xff] }
 0x2c9   :  { %v2001_v27 = vpop.eup %2000 }
 0x2ca   :  { %1626 = vmatmul.mubr.msk.bf16.gmra.mrb[64].mxu0 %vm1196_vm1, %v1329_v58  ;;  %v1241_v52 = vpop.xlane.xlu0 %1240  ;;  %v1288_v24 = vmul.f32 %v2001_v27, %v2745_v22  ;;  %v1319_v18 = vmul.f32 %v1303_v56, %v1287_v13 }
 0x2cb   :  { %v1259_v17 = vmax.f32 %v1241_v52, 1e-24  ;;  %1463 = vmatprep.mubr.bf16.mxu0 %v2034_v2 }
 0x2cc   :  { %v1244_v12 = vpop.xlane.xlu1 %1243  ;;  %v1320_v34 = vmul.f32 %v1304_v16, %v1288_v24 }
 0x2cd   :  { %2006 = vrsqrt.f32 %v1259_v17  ;;  %v1260_v32 = vmax.f32 %v1244_v12, 1e-24 }
 0x2ce   :  { %v1330_v39 = vpack.c.bf16 %v1320_v34, %v1319_v18 }
 0x2cf   :  { %v2003_v20 = vpop.eup %2002  ;;  %2008 = vrsqrt.f32 %v1260_v32 }
 0x2d0   :  { %v1289_v22 = vmul.f32 %v2003_v20, %v2753_v26 }
 0x2d1   :  { %v2005_v63 = vpop.eup %2004 }
 0x2d2   :  { %1627 = vmatmul.mubr.msk.bf16.gmra.mrb[68].mxu0 %vm1196_vm1, %v1330_v39  ;;  %v1290_v40 = vmul.f32 %v2005_v63, %v2755_v62  ;;  %v1321_v19 = vmul.f32 %v1305_v10, %v1289_v22  ;;  %v1307_v62 = vld [vmem:[%s2874_s10 + $0x70] sm:$0xff]  ;;  %s2035_s10 = smov [#allocation2]  }
 0x2d3   :  { %1473 = vmatprep.mubr.bf16.mxu0 %v2034_v2  ;;  %s1531_s25 = sshll.u32 %s2035_s10, 4  ;;  %s1532_s25 = int_to_ptr.vmem [resolvable:$true] %s1531_s25 }
 0x2d4   :  { %v1322_v51 = vmul.f32 %v1306_v60, %v1290_v40  ;;  %s2010_s26 = scalar_lea.vmem %s1532_s25, 4096  ;;  %p2015_p1 = scmp.lt.s32.totalorder %s1532_s25, %s1532_s25 }
 0x2d5   :  { %p2011_p0 = scmp.ne.s32.totalorder %s1532_s25, %s2010_s26  ;;  %p2016_p2 = scmp.lt.s32.totalorder %s2010_s26, %s2010_s26 }
 0x2d6   :  { %v1331_v23 = vpack.c.bf16 %v1322_v51, %v1321_v19 }
 0x2d7   :  { %v2007_v0 = vpop.eup %2006  ;;  %p2017_p3 = por %p2016_p2, %p2015_p1 }
 0x2d8   :  { %v1291_v6 = vmul.f32 %v2007_v0, %v2763_v5 }
 0x2d9   :  { %v2009_v1 = vpop.eup %2008  ;;  %p2018_p4 = pnand %p2017_p3, %p2011_p0 }
 0x2da   :  { %v1292_v26 = vmul.f32 %v2009_v1, %v2765_v47  ;;  %1628 = vmatmul.mubr.msk.bf16.gmra.mrb[72].mxu0 %vm1196_vm1, %v1331_v23  ;;  %v1323_v37 = vmul.f32 %v1307_v62, %v1291_v6 }
 0x2db   :  { %1483 = vmatprep.mubr.bf16.mxu0 %v2034_v2 }
 0x2dc   :  { %v1324_v3 = vmul.f32 %v1308_v28, %v1292_v26 }
 0x2de   :  { %v1332_v42 = vpack.c.bf16 %v1324_v3, %v1323_v37 }
 0x2e2   :  { %1629 = vmatmul.mubr.msk.bf16.gmra.mrb[76].mxu0 %vm1196_vm1, %v1332_v42 }
 0x37d   :  { %v1415_v44 = vpop.f32.mrb[48].mxu0 }
 0x37e   :  { %1494 = vst [vmem:[#allocation2] sm:$0xff] %v1415_v44  ;;  %v1417_v14 = vpop.f32.mrb[49].mxu0 }
 0x37f   :  { %1495 = vst [vmem:[#allocation2 + $0x8] sm:$0xff] %v1417_v14  ;;  %v1419_v5 = vpop.f32.mrb[50].mxu0 }
 0x380   :  { %1496 = vst [vmem:[#allocation2 + $0x10] sm:$0xff] %v1419_v5  ;;  %v1421_v47 = vpop.f32.mrb[51].mxu0 }
 0x381   :  { %1497 = vst [vmem:[#allocation2 + $0x18] sm:$0xff] %v1421_v47 }
 0x385   :  { %v1425_v43 = vpop.f32.mrb[52].mxu0 }
 0x386   :  { %1498 = vst [vmem:[#allocation2 + $0x20] sm:$0xff] %v1425_v43  ;;  %v1427_v2 = vpop.f32.mrb[53].mxu0 }
 0x387   :  { %1499 = vst [vmem:[#allocation2 + $0x28] sm:$0xff] %v1427_v2  ;;  %v1429_v45 = vpop.f32.mrb[54].mxu0 }
 0x388   :  { %1500 = vst [vmem:[#allocation2 + $0x30] sm:$0xff] %v1429_v45  ;;  %v1431_v50 = vpop.f32.mrb[55].mxu0 }
 0x389   :  { %1501 = vst [vmem:[#allocation2 + $0x38] sm:$0xff] %v1431_v50 }
 0x38d   :  { %v1435_v53 = vpop.f32.mrb[56].mxu0 }
 0x38e   :  { %1502 = vst [vmem:[#allocation2 + $0x40] sm:$0xff] %v1435_v53  ;;  %v1437_v9 = vpop.f32.mrb[57].mxu0 }
 0x38f   :  { %1503 = vst [vmem:[#allocation2 + $0x48] sm:$0xff] %v1437_v9  ;;  %v1439_v55 = vpop.f32.mrb[58].mxu0 }
 0x390   :  { %1504 = vst [vmem:[#allocation2 + $0x50] sm:$0xff] %v1439_v55  ;;  %v1441_v38 = vpop.f32.mrb[59].mxu0 }
 0x391   :  { %1505 = vst [vmem:[#allocation2 + $0x58] sm:$0xff] %v1441_v38 }
 0x395   :  { %v1445_v25 = vpop.f32.mrb[60].mxu0 }
 0x396   :  { %1506 = vst [vmem:[#allocation2 + $0x60] sm:$0xff] %v1445_v25  ;;  %v1447_v29 = vpop.f32.mrb[61].mxu0 }
 0x397   :  { %1507 = vst [vmem:[#allocation2 + $0x68] sm:$0xff] %v1447_v29  ;;  %v1449_v48 = vpop.f32.mrb[62].mxu0 }
 0x398   :  { %1508 = vst [vmem:[#allocation2 + $0x70] sm:$0xff] %v1449_v48  ;;  %v1451_v41 = vpop.f32.mrb[63].mxu0 }
 0x399   :  { %1509 = vst [vmem:[#allocation2 + $0x78] sm:$0xff] %v1451_v41 }
 0x39d   :  { %v1455_v57 = vpop.f32.mrb[64].mxu0 }
 0x39e   :  { %1510 = vst [vmem:[#allocation2 + $0x80] sm:$0xff] %v1455_v57  ;;  %v1457_v33 = vpop.f32.mrb[65].mxu0 }
 0x39f   :  { %1511 = vst [vmem:[#allocation2 + $0x88] sm:$0xff] %v1457_v33  ;;  %v1459_v61 = vpop.f32.mrb[66].mxu0 }
 0x3a0   :  { %1512 = vst [vmem:[#allocation2 + $0x90] sm:$0xff] %v1459_v61  ;;  %v1461_v49 = vpop.f32.mrb[67].mxu0 }
 0x3a1   :  { %1513 = vst [vmem:[#allocation2 + $0x98] sm:$0xff] %v1461_v49 }
 0x3a5   :  { %v1465_v21 = vpop.f32.mrb[68].mxu0 }
 0x3a6   :  { %1514 = vst [vmem:[#allocation2 + $0xa0] sm:$0xff] %v1465_v21  ;;  %v1467_v30 = vpop.f32.mrb[69].mxu0 }
 0x3a7   :  { %1515 = vst [vmem:[#allocation2 + $0xa8] sm:$0xff] %v1467_v30  ;;  %v1469_v7 = vpop.f32.mrb[70].mxu0 }
 0x3a8   :  { %1516 = vst [vmem:[#allocation2 + $0xb0] sm:$0xff] %v1469_v7  ;;  %v1471_v54 = vpop.f32.mrb[71].mxu0 }
 0x3a9   :  { %1517 = vst [vmem:[#allocation2 + $0xb8] sm:$0xff] %v1471_v54 }
 0x3ad   :  { %v1475_v4 = vpop.f32.mrb[72].mxu0 }
 0x3ae   :  { %1518 = vst [vmem:[#allocation2 + $0xc0] sm:$0xff] %v1475_v4  ;;  %v1477_v11 = vpop.f32.mrb[73].mxu0 }
 0x3af   :  { %1519 = vst [vmem:[#allocation2 + $0xc8] sm:$0xff] %v1477_v11  ;;  %v1479_v31 = vpop.f32.mrb[74].mxu0 }
 0x3b0   :  { %1520 = vst [vmem:[#allocation2 + $0xd0] sm:$0xff] %v1479_v31  ;;  %v1481_v59 = vpop.f32.mrb[75].mxu0 }
 0x3b1   :  { %1521 = vst [vmem:[#allocation2 + $0xd8] sm:$0xff] %v1481_v59 }
 0x3b5   :  { %v1485_v36 = vpop.f32.mrb[76].mxu0 }
 0x3b6   :  { %1522 = vst [vmem:[#allocation2 + $0xe0] sm:$0xff] %v1485_v36  ;;  %v1487_v15 = vpop.f32.mrb[77].mxu0 }
 0x3b7   :  { %1523 = vst [vmem:[#allocation2 + $0xe8] sm:$0xff] %v1487_v15  ;;  %v1489_v35 = vpop.f32.mrb[78].mxu0 }
 0x3b8   :  { %1524 = vst [vmem:[#allocation2 + $0xf0] sm:$0xff] %v1489_v35  ;;  %v1491_v8 = vpop.f32.mrb[79].mxu0 }
 0x3b9   :  { %1525 = vst [vmem:[#allocation2 + $0xf8] sm:$0xff] %v1491_v8 }
 0x3ba   :  { %2021 = shalt.err (!%p2018_p4)
}
 0x3bb   :  { %s2022_s29 = scalar_lea.hbm %s2876_s12, 4096 }
 0x3bc   :  { %p2023_p5 = scmp.ne.s32.totalorder %s2876_s12, %s2022_s29  ;;  %p2026_p6 = scmp.lt.u32.totalorder %s2022_s29, %s2876_s12 }
 0x3be   :  { %p2028_p7 = pnand %p2026_p6, %p2023_p5 }
 0x3c0   :  { %2031 = shalt.err (!%p2028_p7)
}
 0x3c1   :  { %s2036_s14 = smov 256   ;;  %s2037_s1 = smov 16  }
 0x3c2   :  { %1537 = dma.vmem_to_hbm [thread:$0]  %s1532_s25, 4096, %s2876_s12, [#allocation3], %s2036_s14, %s2036_s14, %s2037_s1  }
 0x3c3   :  { %2032 = dma.done.wait [#allocation3], 4096  }
 0x3c4   :  { %2033 = vsyncadd [#allocation3], 4294963200 }
 0x3c5   :  { %1541 = vsyncpa [#allocation3], 1 }

</bundles_post_ra>
